<compile_context>
chip_gen: v7x
topology: tpu7x:2x2x1
jax: 0.10.0
libtpu: 0.0.40
codegen_flags: <defaults>
</compile_context>

<pallas_src>
import math
import numpy as np
import jax
import jax.numpy as jnp
from jax.experimental import pallas as pl
from jax.experimental.pallas import tpu as pltpu

# ---------------- config (mirrors RoiHeads.__init__ at small synthetic sizes) ---
NUM_CLASSES = 5            # includes background class 0
POOL = 7                   # MultiScaleRoIAlign output_size
SAMPLING_RATIO = 2
CORNERS = SAMPLING_RATIO * SAMPLING_RATIO * 4   # 16 weighted corner slots per bin
REPR_SIZE = 32             # TwoMLPHead representation size
REPR_PAD = 128             # lane-padded hidden width (full-width vregs)
BBOX_REG_WEIGHTS = (10.0, 10.0, 5.0, 5.0)
BBOX_XFORM_CLIP = math.log(1000.0 / 16.0)
SCORE_THRESH = 0.05
NMS_THRESH = 0.5
DETECTIONS_PER_IMG = 100
MIN_BOX_SIZE = 0.01

MAX_TILE_R = 256           # fills v6e/v7x MXU M; 128 already fills v5e's MXU
PRED_PAD = 128             # lane-padded fused predictor width (>= 5*NUM_CLASSES)


# ------------------------- generation-aware VMEM budget --------------------------
_VMEM_BUDGET = None


def _vmem_budget_bytes():
    """75% of this chip's VMEM (v5e/v6e: 128 MiB, v7x: 64 MiB); safe fallback."""
    global _VMEM_BUDGET
    if _VMEM_BUDGET is None:
        try:
            cap = int(pltpu.get_tpu_info().vmem_capacity_bytes)
        except Exception:
            cap = 64 * 1024 * 1024          # conservative: v7x per-core VMEM
        _VMEM_BUDGET = (cap * 3) // 4
    return _VMEM_BUDGET


def _pick_tile_r(num_rois, k_dim, vmem_budget):
    """ROIs per grid step: fill the MXU M dim and amortize the ~0.35us/step
    pipeline overhead at production sizes; for tiny inputs split into two tiles
    so the "parallel" grid axis can still shard across v7x's two TensorCores;
    cap by the double-buffered streaming VMEM footprint."""
    if num_rois >= 2 * MAX_TILE_R:
        tile = MAX_TILE_R
    else:
        half = (num_rois + 1) // 2
        tile = max(8, ((half + 7) // 8) * 8)

    def stream_bytes(t):
        return 2 * (CORNERS * t * k_dim * 2            # gathered feats (bf16)
                    + CORNERS * t * POOL * POOL * 4    # bilinear weights (f32)
                    + t * (4 + 2) * 4                  # proposals + image (h,w)
                    + 2 * t * PRED_PAD * 4)            # two output slabs

    while tile > 8 and stream_bytes(tile) > (vmem_budget * 3) // 4:
        tile = max(8, ((tile // 2) // 8) * 8)
    return tile


# --------------- probe: single-buffered resident weights (Buffered(1)) ----------
_SINGLE_BUFFER_OK = None


def _weights_single_buffer_supported():
    """Probe whether pipeline_mode=pl.Buffered(1) is accepted by this build.
    Grid-invariant weight blocks never change, so their second pipeline buffer
    is pure VMEM waste at production sizes."""
    global _SINGLE_BUFFER_OK
    if _SINGLE_BUFFER_OK is None:
        try:
            def _probe(w_ref, x_ref, o_ref):
                o_ref[...] = x_ref[...] + w_ref[...]

            w = jnp.ones((8, 128), jnp.float32)
            x = jnp.ones((16, 128), jnp.float32)
            out = pl.pallas_call(
                _probe,
                out_shape=jax.ShapeDtypeStruct((16, 128), jnp.float32),
                grid=(2,),
                in_specs=[pl.BlockSpec((8, 128), lambda i: (0, 0),
                                       pipeline_mode=pl.Buffered(1)),
                          pl.BlockSpec((8, 128), lambda i: (i, 0))],
                out_specs=pl.BlockSpec((8, 128), lambda i: (i, 0)),
                compiler_params=pltpu.CompilerParams(
                    dimension_semantics=("parallel",)),
            )(w, x)
            jax.block_until_ready(out)
            _SINGLE_BUFFER_OK = True
        except Exception:
            _SINGLE_BUFFER_OK = False
    return _SINGLE_BUFFER_OK


def _weight_spec(block_shape):
    if _weights_single_buffer_supported():
        return pl.BlockSpec(block_shape, lambda i: (0, 0),
                            pipeline_mode=pl.Buffered(1))
    return pl.BlockSpec(block_shape, lambda i: (0, 0))


# =====================  fused Pallas kernel (per ROI tile)  =====================
def _fused_roi_heads_kernel(g_ref, wt_ref, props_ref, imghw_ref,
                            w6_ref, b6_ref, w7_ref, b7_ref, wp_ref, bp_ref,
                            scores_ref, boxes_ref):
    nc = NUM_CLASSES
    k_dim = g_ref.shape[2]
    channels = k_dim // (POOL * POOL)

    # ---- RoIAlign combine: unrolled per-corner FMA chain (VALU; no XLU reduce).
    # Gathered corner features arrive bf16, channel-major lanes (c*49 + bin).
    # The per-bin bilinear weight is lane-broadcast across channels by tiling
    # the 49-wide weight row `channels` times (lane concat).
    def corner_term(ci):
        w_bin = wt_ref[ci]                                        # [TR, 49] f32
        w_full = jnp.concatenate([w_bin] * channels, axis=-1)     # [TR, K]
        return g_ref[ci].astype(jnp.float32) * w_full             # bf16 -> f32 widen

    pooled = corner_term(0)
    for ci in range(1, CORNERS):
        pooled = pooled + corner_term(ci)

    # ---- box_head (TwoMLPHead): bf16 MXU operands, f32 accumulation,
    # hidden dim lane-padded to 128 so h6/h7 are full-width vregs.
    h6 = jnp.dot(pooled.astype(jnp.bfloat16), w6_ref[...],
                 preferred_element_type=jnp.float32) + b6_ref[...]
    h6 = jnp.maximum(h6, 0.0)
    h7 = jnp.dot(h6.astype(jnp.bfloat16), w7_ref[...],
                 preferred_element_type=jnp.float32) + b7_ref[...]
    h7 = jnp.maximum(h7, 0.0)

    # ---- box_predictor: one fused lane-padded matmul.
    # cols: [0:nc]=logits, [nc:2nc]=dx/wx, [2nc:3nc]=dy/wy,
    #       [3nc:4nc]=dw/ww, [4nc:5nc]=dh/wh, rest zero-padded.
    head = jnp.dot(h7.astype(jnp.bfloat16), wp_ref[...],
                   preferred_element_type=jnp.float32) + bp_ref[...]

    # ---- softmax over classes (masked over the padded lane dim); exact division
    # for score parity with the PyTorch reference near SCORE_THRESH.
    lane = jax.lax.broadcasted_iota(jnp.int32, head.shape, 1)
    logits = jnp.where(lane < nc, head, -jnp.inf)
    m = jnp.max(logits, axis=-1, keepdims=True)
    e = jnp.exp(logits - m)
    scores_ref[...] = e / jnp.sum(e, axis=-1, keepdims=True)      # [TR, 128] store

    # ---- BoxCoder.decode + clip_boxes_to_image (vectorized over classes) ----
    p = props_ref[...]                             # [TR, 4]
    widths = p[:, 2:3] - p[:, 0:1]
    heights = p[:, 3:4] - p[:, 1:2]
    ctr_x = p[:, 0:1] + 0.5 * widths
    ctr_y = p[:, 1:2] + 0.5 * heights

    dx = head[:, nc:2 * nc]                        # 1/weights already folded in
    dy = head[:, 2 * nc:3 * nc]
    dw = jnp.minimum(head[:, 3 * nc:4 * nc], BBOX_XFORM_CLIP)
    dh = jnp.minimum(head[:, 4 * nc:5 * nc], BBOX_XFORM_CLIP)

    pred_ctr_x = dx * widths + ctr_x
    pred_ctr_y = dy * heights + ctr_y
    pred_w = jnp.exp(dw) * widths
    pred_h = jnp.exp(dh) * heights

    x1 = pred_ctr_x - 0.5 * pred_w
    y1 = pred_ctr_y - 0.5 * pred_h
    x2 = pred_ctr_x + 0.5 * pred_w
    y2 = pred_ctr_y + 0.5 * pred_h

    h_img = imghw_ref[:, 0:1]
    w_img = imghw_ref[:, 1:2]
    x1 = jnp.clip(x1, 0.0, w_img)
    x2 = jnp.clip(x2, 0.0, w_img)
    y1 = jnp.clip(y1, 0.0, h_img)
    y2 = jnp.clip(y2, 0.0, h_img)

    zpad = jnp.zeros((x1.shape[0], PRED_PAD - 4 * nc), jnp.float32)
    # planar layout [x1(all classes) | y1 | x2 | y2 | pad] -> lane-dense store
    boxes_ref[...] = jnp.concatenate([x1, y1, x2, y2, zpad], axis=-1)


def fused_roi_heads_pallas(g3, wts, rois_p, imghw, params, tile_r):
    corners, rp, k = g3.shape
    grid = (rp // tile_r,)

    def nbytes(a):
        return int(a.size) * a.dtype.itemsize

    weight_bytes = sum(nbytes(params[n]) for n in ('w6', 'b6', 'w7', 'b7', 'wp', 'bp'))
    cost = pl.CostEstimate(
        flops=2 * rp * (corners * k + k * REPR_PAD + REPR_PAD * REPR_PAD
                        + REPR_PAD * PRED_PAD),
        transcendentals=rp * 3 * NUM_CLASSES,
        bytes_accessed=(nbytes(g3) + nbytes(wts) + nbytes(rois_p) + nbytes(imghw)
                        + weight_bytes + 2 * rp * PRED_PAD * 4),
    )

    return pl.pallas_call(
        _fused_roi_heads_kernel,
        out_shape=(jax.ShapeDtypeStruct((rp, PRED_PAD), jnp.float32),
                   jax.ShapeDtypeStruct((rp, PRED_PAD), jnp.float32)),
        grid=grid,
        in_specs=[
            pl.BlockSpec((corners, tile_r, k), lambda i: (0, i, 0)),            # feats (bf16)
            pl.BlockSpec((corners, tile_r, POOL * POOL), lambda i: (0, i, 0)),  # bilinear wts
            pl.BlockSpec((tile_r, 4), lambda i: (i, 0)),                        # proposals
            pl.BlockSpec((tile_r, 2), lambda i: (i, 0)),                        # image (h, w)
            _weight_spec((k, REPR_PAD)),              # w6 (bf16, lane-padded)
            _weight_spec((1, REPR_PAD)),              # b6
            _weight_spec((REPR_PAD, REPR_PAD)),       # w7 (bf16, lane-padded)
            _weight_spec((1, REPR_PAD)),              # b7
            _weight_spec((REPR_PAD, PRED_PAD)),       # fused predictor W (bf16)
            _weight_spec((1, PRED_PAD)),              # fused predictor b
        ],
        out_specs=(pl.BlockSpec((tile_r, PRED_PAD), lambda i: (i, 0)),
                   pl.BlockSpec((tile_r, PRED_PAD), lambda i: (i, 0))),
        compiler_params=pltpu.CompilerParams(
            dimension_semantics=("parallel",),        # v7x: shard ROI tiles over 2 TCs
            vmem_limit_bytes=_vmem_budget_bytes()),
        cost_estimate=cost,
    )(g3, wts, rois_p, imghw,
      params['w6'], params['b6'], params['w7'], params['b7'],
      params['wp'], params['bp'])


# -------- RoIAlign gather indices + bilinear weights (torchvision semantics) ----
def build_roi_align_gather(rois, H, W, spatial_scale):
    """Returns sp_idx [CORNERS, R, 49] int32 flat spatial indices into [H*W]
    and wts [CORNERS, R, 49] float32 bilinear weights (valid-masked, /sr^2),
    replicating torchvision roi_align (aligned=False, sampling_ratio=2)."""
    R = rois.shape[0]
    sr = SAMPLING_RATIO
    start_w = rois[:, 0] * spatial_scale
    start_h = rois[:, 1] * spatial_scale
    end_w = rois[:, 2] * spatial_scale
    end_h = rois[:, 3] * spatial_scale
    roi_w = jnp.maximum(end_w - start_w, 1.0)
    roi_h = jnp.maximum(end_h - start_h, 1.0)
    bin_w = roi_w / POOL
    bin_h = roi_h / POOL

    ph = jnp.arange(POOL, dtype=jnp.float32)
    sri = jnp.arange(sr, dtype=jnp.float32)
    full = (R, POOL, POOL, sr, sr)                 # (roi, ph, pw, iy, ix)
    bh = bin_h[:, None, None, None, None]
    bw = bin_w[:, None, None, None, None]
    y = (start_h[:, None, None, None, None]
         + ph[None, :, None, None, None] * bh
         + (sri[None, None, None, :, None] + 0.5) * bh / sr)
    x = (start_w[:, None, None, None, None]
         + ph[None, None, :, None, None] * bw
         + (sri[None, None, None, None, :] + 0.5) * bw / sr)
    y = jnp.broadcast_to(y, full)
    x = jnp.broadcast_to(x, full)

    valid = ~((y < -1.0) | (y > H) | (x < -1.0) | (x > W))

    yc = jnp.maximum(y, 0.0)
    xc = jnp.maximum(x, 0.0)
    y_low0 = jnp.floor(yc).astype(jnp.int32)
    x_low0 = jnp.floor(xc).astype(jnp.int32)
    ycond = y_low0 >= H - 1
    xcond = x_low0 >= W - 1
    y_low = jnp.where(ycond, H - 1, y_low0)
    y_high = jnp.where(ycond, H - 1, y_low0 + 1)
    yf = jnp.where(ycond, jnp.float32(H - 1), yc)
    x_low = jnp.where(xcond, W - 1, x_low0)
    x_high = jnp.where(xcond, W - 1, x_low0 + 1)
    xf = jnp.where(xcond, jnp.float32(W - 1), xc)

    ly = yf - y_low.astype(jnp.float32)
    lx = xf - x_low.astype(jnp.float32)
    hy = 1.0 - ly
    hx = 1.0 - lx
    vw = valid.astype(jnp.float32) / float(sr * sr)
    w1 = hy * hx * vw
    w2 = hy * lx * vw
    w3 = ly * hx * vw
    w4 = ly * lx * vw

    c1 = y_low * W + x_low
    c2 = y_low * W + x_high
    c3 = y_high * W + x_low
    c4 = y_high * W + x_high

    idx6 = jnp.stack([c1, c2, c3, c4], axis=0)     # [4, R, PH, PW, IY, IX]
    wts6 = jnp.stack([w1, w2, w3, w4], axis=0)
    # -> [CORNERS, R, 49] with corners = (corner4, iy, ix) and bins = (ph, pw)
    idx = jnp.transpose(idx6, (0, 4, 5, 1, 2, 3)).reshape(CORNERS, R, POOL * POOL)
    wts = jnp.transpose(wts6, (0, 4, 5, 1, 2, 3)).reshape(CORNERS, R, POOL * POOL)
    return idx.astype(jnp.int32), wts


# ----------------------------- forward (inference) ------------------------------
@jax.jit
def _forward_core(params, feat, rois, batch_idx, imghw):
    B, C, H, W = feat.shape
    R = rois.shape[0]
    spatial_scale = 1.0                    # single FPN level, same resolution as image

    sp_idx, wts = build_roi_align_gather(rois, H, W, spatial_scale)

    # Corner gather, emitted directly in the layout the kernel consumes
    # ([CORNERS, R, C*49], channel-major lanes) -> no wrapper transpose copy;
    # features cast to bf16 once -> half the HBM bytes on the dominant stream.
    # TODO(synk): at production feature-map sizes, replace this XLA gather with an
    # in-kernel scalar-prefetch + DMA gather (or per-ROI rectangle DMA) so the
    # gathered slab never round-trips through HBM.
    feat_cs = feat.astype(jnp.bfloat16).reshape(B * C, H * W)
    rows = batch_idx[:, None] * C + jnp.arange(C, dtype=jnp.int32)[None, :]   # [R, C]
    g4 = feat_cs[rows[None, :, :, None], sp_idx[:, :, None, :]]               # [16, R, C, 49]
    K = C * POOL * POOL
    g3 = g4.reshape(CORNERS, R, K)                                            # free reshape

    tile_r = _pick_tile_r(R, K, _vmem_budget_bytes())
    rp = pl.cdiv(R, tile_r) * tile_r
    pad = rp - R
    rois_p = rois
    if pad:
        g3 = jnp.pad(g3, ((0, 0), (0, pad), (0, 0)))
        wts = jnp.pad(wts, ((0, 0), (0, pad), (0, 0)))
        rois_p = jnp.pad(rois, ((0, pad), (0, 0)))
        imghw = jnp.pad(imghw, ((0, pad), (0, 0)))

    scores_pad, boxes_pad = fused_roi_heads_pallas(g3, wts, rois_p, imghw,
                                                   params, tile_r)

    scores = scores_pad[:R, :NUM_CLASSES]
    planar = boxes_pad[:R, :4 * NUM_CLASSES]                   # [R, x1|y1|x2|y2 per class]
    pred_boxes = planar.reshape(R, 4, NUM_CLASSES).transpose(0, 2, 1)   # [R, NC, 4]
    return scores, pred_boxes


def roi_heads_forward(params, features, proposals, image_shapes):
    _weights_single_buffer_supported()         # probe once, outside the jitted trace
    feat = features['0']                       # [B, C, H, W] (NCHW)
    boxes_per_image = [int(p.shape[0]) for p in proposals]
    rois = jnp.concatenate(proposals, axis=0)  # [R, 4]
    batch_idx = jnp.concatenate(
        [jnp.full((n,), i, jnp.int32) for i, n in enumerate(boxes_per_image)])
    hw = jnp.asarray(image_shapes, jnp.float32)        # [B, 2] (h, w)
    imghw = hw[batch_idx]                              # [R, 2]
    scores, pred_boxes = _forward_core(params, feat, rois, batch_idx, imghw)
    return scores, pred_boxes, boxes_per_image


# --------------- host-side dynamic-shape filtering (numpy glue) -----------------
# TODO(synk): score threshold / remove_small_boxes / batched NMS produce
# data-dependent shapes; kept on host.
def _nms_np(boxes, scores, thresh):
    if boxes.shape[0] == 0:
        return np.zeros((0,), np.int64)
    order = np.argsort(-scores, kind='stable')
    areas = (boxes[:, 2] - boxes[:, 0]) * (boxes[:, 3] - boxes[:, 1])
    suppressed = np.zeros(boxes.shape[0], bool)
    keep = []
    for a in range(order.shape[0]):
        i = order[a]
        if suppressed[i]:
            continue
        keep.append(i)
        for b in range(a + 1, order.shape[0]):
            j = order[b]
            if suppressed[j]:
                continue
            xx1 = max(boxes[i, 0], boxes[j, 0]); yy1 = max(boxes[i, 1], boxes[j, 1])
            xx2 = min(boxes[i, 2], boxes[j, 2]); yy2 = min(boxes[i, 3], boxes[j, 3])
            inter = max(0.0, xx2 - xx1) * max(0.0, yy2 - yy1)
            union = areas[i] + areas[j] - inter
            iou = inter / union if union > 0 else 0.0
            if iou > thresh:
                suppressed[j] = True
    return np.asarray(keep, np.int64)


def _batched_nms_np(boxes, scores, labels, thresh):
    if boxes.shape[0] == 0:
        return np.zeros((0,), np.int64)
    max_coord = boxes.max()
    offsets = labels.astype(boxes.dtype) * (max_coord + 1.0)
    return _nms_np(boxes + offsets[:, None], scores, thresh)


def host_filter(scores, pred_boxes, boxes_per_image):
    scores = np.asarray(scores)
    pred_boxes = np.asarray(pred_boxes)
    num_classes = scores.shape[1]
    results = []
    start = 0
    for n in boxes_per_image:
        s = scores[start:start + n, 1:]
        b = pred_boxes[start:start + n, 1:, :]
        lab = np.broadcast_to(np.arange(num_classes)[None, :],
                              (n, num_classes))[:, 1:]
        start += n
        b = b.reshape(-1, 4)
        s = s.reshape(-1)
        lab = lab.reshape(-1)
        inds = np.where(s > SCORE_THRESH)[0]
        b, s, lab = b[inds], s[inds], lab[inds]
        ws = b[:, 2] - b[:, 0]
        hs = b[:, 3] - b[:, 1]
        keep = np.where((ws >= MIN_BOX_SIZE) & (hs >= MIN_BOX_SIZE))[0]
        b, s, lab = b[keep], s[keep], lab[keep]
        keep = _batched_nms_np(b, s, lab, NMS_THRESH)[:DETECTIONS_PER_IMG]
        results.append({'boxes': b[keep], 'scores': s[keep], 'labels': lab[keep]})
    return results


# --------------------------------- params ---------------------------------------
def init_params(key, C, repr_size, num_classes):
    in_dim = C * POOL * POOL
    ks = jax.random.split(key, 6)

    def w(k, shape, scale=0.05):
        return jax.random.normal(k, shape, jnp.float32) * scale

    # "torch layout" parameters; w6 rows ordered (c, ph, pw) = natural flatten,
    # which is exactly the channel-major lane order the kernel produces.
    w6 = w(ks[0], (in_dim, repr_size))
    b6 = jnp.zeros((repr_size,), jnp.float32)
    w7 = w(ks[1], (repr_size, repr_size))
    b7 = jnp.zeros((repr_size,), jnp.float32)
    wc = w(ks[2], (repr_size, num_classes))
    bc = w(ks[3], (num_classes,), 0.01)
    wb = w(ks[4], (repr_size, num_classes * 4))   # cols ordered (class, dx/dy/dw/dh)
    bb = w(ks[5], (num_classes * 4,), 0.01)

    # fuse class + box heads into one lane-padded matmul; fold BoxCoder 1/weights
    wx, wy, ww, wh = BBOX_REG_WEIGHTS

    def coord_cols(a, coord, scale_):
        return a[..., coord::4] / scale_

    wp = jnp.concatenate([wc,
                          coord_cols(wb, 0, wx), coord_cols(wb, 1, wy),
                          coord_cols(wb, 2, ww), coord_cols(wb, 3, wh)], axis=1)
    bp = jnp.concatenate([bc,
                          coord_cols(bb, 0, wx), coord_cols(bb, 1, wy),
                          coord_cols(bb, 2, ww), coord_cols(bb, 3, wh)], axis=0)
    wp = jnp.pad(wp, ((0, REPR_PAD - repr_size), (0, PRED_PAD - 5 * num_classes)))
    bp = jnp.pad(bp, (0, PRED_PAD - 5 * num_classes))[None, :]

    # lane-pad the hidden dim to 128 so h6/h7 are full-width, unmasked vregs
    w6p = jnp.pad(w6, ((0, 0), (0, REPR_PAD - repr_size)))
    b6p = jnp.pad(b6, (0, REPR_PAD - repr_size))[None, :]
    w7p = jnp.pad(w7, ((0, REPR_PAD - repr_size), (0, REPR_PAD - repr_size)))
    b7p = jnp.pad(b7, (0, REPR_PAD - repr_size))[None, :]

    return {
        'w6': w6p.astype(jnp.bfloat16), 'b6': b6p,
        'w7': w7p.astype(jnp.bfloat16), 'b7': b7p,
        'wp': wp.astype(jnp.bfloat16),  'bp': bp,
    }


# TODO(synk): mask branch (mask_roi_pool / mask_head / mask_predictor) is None in
# this synthetic setup, so has_mask() == False and the mask path is skipped.

if __name__ == "__main__":
    key = jax.random.PRNGKey(0)
    kf, kp1, kp2, kparams = jax.random.split(key, 4)

    B, C, H, W = 2, 4, 16, 16
    features = {'0': jax.random.normal(kf, (B, C, H, W), jnp.float32)}
    image_shapes = [(H, W)] * B

    def make_proposals(k, n):
        k1, k2 = jax.random.split(k)
        xy1 = jax.random.uniform(k1, (n, 2), minval=0.0, maxval=8.0)
        wh = jax.random.uniform(k2, (n, 2), minval=2.0, maxval=7.0)
        return jnp.concatenate([xy1, xy1 + wh], axis=1).astype(jnp.float32)

    proposals = [make_proposals(kp1, 8), make_proposals(kp2, 8)]

    params = init_params(kparams, C, REPR_SIZE, NUM_CLASSES)

    scores, pred_boxes, bpi = roi_heads_forward(params, features, proposals,
                                                image_shapes)
    jax.block_until_ready((scores, pred_boxes))

    assert scores.shape == (16, NUM_CLASSES)
    assert pred_boxes.shape == (16, NUM_CLASSES, 4)
    assert bool(jnp.all(jnp.isfinite(scores))) and bool(jnp.all(jnp.isfinite(pred_boxes)))

    result = host_filter(scores, pred_boxes, bpi)
    assert len(result) == B
    for r in result:
        assert r['boxes'].ndim == 2 and r['boxes'].shape[-1] == 4
        assert r['scores'].shape[0] == r['boxes'].shape[0]
        assert r['labels'].shape[0] == r['boxes'].shape[0]

    print("KERNEL_OK")
</pallas_src>

<mosaic_0001>
module attributes {stable_mosaic.version = 11 : i64} {
  func.func @_probe(%arg0: i32, %arg1: memref<8x128xf32, #tpu.memory_space<vmem>>, %arg2: memref<8x128xf32, #tpu.memory_space<vmem>>, %arg3: memref<8x128xf32, #tpu.memory_space<vmem>>) attributes {dimension_semantics = [#tpu.dimension_semantics<parallel>], iteration_bounds = array<i64: 2>, scalar_prefetch = 0 : i64, scratch_operands = 0 : i64, tpu.core_type = #tpu.core_type<tc>, window_params = [{pipeline_mode = #tpu.pipeline_mode<synchronous>, transform_indices = @transform_0, window_bounds = array<i64: 8, 128>}, {transform_indices = @transform_1, window_bounds = array<i64: 8, 128>}, {transform_indices = @transform_2, window_bounds = array<i64: 8, 128>}]} {
    %c0 = arith.constant 0 : index
    %c0_0 = arith.constant 0 : index
    %0 = vector.load %arg2[%c0, %c0_0] : memref<8x128xf32, #tpu.memory_space<vmem>>, vector<8x128xf32>
    %c0_1 = arith.constant 0 : index
    %c0_2 = arith.constant 0 : index
    %1 = vector.load %arg1[%c0_1, %c0_2] : memref<8x128xf32, #tpu.memory_space<vmem>>, vector<8x128xf32>
    %2 = arith.addf %0, %1 : vector<8x128xf32>
    %c0_3 = arith.constant 0 : index
    %c0_4 = arith.constant 0 : index
    %3 = vector.load %arg3[%c0_3, %c0_4] : memref<8x128xf32, #tpu.memory_space<vmem>>, vector<8x128xf32>
    tpu.vector_store %arg3[%c0_3, %c0_4], %2 {strides = array<i32>} : memref<8x128xf32, #tpu.memory_space<vmem>>, vector<8x128xf32>,
    return
  }
  func.func @transform_0(%arg0: i32) -> (i32, i32) {
    %c0_i32 = arith.constant 0 : i32
    %c0_i32_0 = arith.constant 0 : i32
    %c0_i32_1 = arith.constant 0 : i32
    return %c0_i32, %c0_i32_0 : i32, i32
  }
  func.func @transform_1(%arg0: i32) -> (i32, i32) {
    %c0_i32 = arith.constant 0 : i32
    %c0_i32_0 = arith.constant 0 : i32
    return %arg0, %c0_i32 : i32, i32
  }
  func.func @transform_2(%arg0: i32) -> (i32, i32) {
    %c0_i32 = arith.constant 0 : i32
    %c0_i32_0 = arith.constant 0 : i32
    return %arg0, %c0_i32 : i32, i32
  }
}

module attributes {stable_mosaic.version = 11 : i64} {
  func.func @_fused_roi_heads_kernel(%arg0: i32, %arg1: memref<16x8x196xbf16, #tpu.memory_space<vmem>>, %arg2: memref<16x8x49xf32, #tpu.memory_space<vmem>>, %arg3: memref<8x4xf32, #tpu.memory_space<vmem>>, %arg4: memref<8x2xf32, #tpu.memory_space<vmem>>, %arg5: memref<196x128xbf16, #tpu.memory_space<vmem>>, %arg6: memref<1x128xf32, #tpu.memory_space<vmem>>, %arg7: memref<128x128xbf16, #tpu.memory_space<vmem>>, %arg8: memref<1x128xf32, #tpu.memory_space<vmem>>, %arg9: memref<128x128xbf16, #tpu.memory_space<vmem>>, %arg10: memref<1x128xf32, #tpu.memory_space<vmem>>, %arg11: memref<8x128xf32, #tpu.memory_space<vmem>>, %arg12: memref<8x128xf32, #tpu.memory_space<vmem>>) attributes {dimension_semantics = [#tpu.dimension_semantics<parallel>], iteration_bounds = array<i64: 2>, scalar_prefetch = 0 : i64, scratch_operands = 0 : i64, tpu.core_type = #tpu.core_type<tc>, window_params = [{transform_indices = @transform_0, window_bounds = array<i64: 16, 8, 196>}, {transform_indices = @transform_1, window_bounds = array<i64: 16, 8, 49>}, {transform_indices = @transform_2, window_bounds = array<i64: 8, 4>}, {transform_indices = @transform_3, window_bounds = array<i64: 8, 2>}, {pipeline_mode = #tpu.pipeline_mode<synchronous>, transform_indices = @transform_4, window_bounds = array<i64: 196, 128>}, {pipeline_mode = #tpu.pipeline_mode<synchronous>, transform_indices = @transform_5, window_bounds = array<i64: 1, 128>}, {pipeline_mode = #tpu.pipeline_mode<synchronous>, transform_indices = @transform_6, window_bounds = array<i64: 128, 128>}, {pipeline_mode = #tpu.pipeline_mode<synchronous>, transform_indices = @transform_7, window_bounds = array<i64: 1, 128>}, {pipeline_mode = #tpu.pipeline_mode<synchronous>, transform_indices = @transform_8, window_bounds = array<i64: 128, 128>}, {pipeline_mode = #tpu.pipeline_mode<synchronous>, transform_indices = @transform_9, window_bounds = array<i64: 1, 128>}, {transform_indices = @transform_10, window_bounds = array<i64: 8, 128>}, {transform_indices = @transform_11, window_bounds = array<i64: 8, 128>}]} {
    %c0 = arith.constant 0 : index
    %c0_0 = arith.constant 0 : index
    %c0_1 = arith.constant 0 : index
    %0 = vector.load %arg2[%c0, %c0_0, %c0_1] : memref<16x8x49xf32, #tpu.memory_space<vmem>>, vector<1x8x49xf32>
    %1 = vector.shape_cast %0 : vector<1x8x49xf32> to vector<8x49xf32>
    %2 = tpu.concatenate %1, %1, %1, %1 in 1 : vector<8x49xf32>, vector<8x49xf32>, vector<8x49xf32>, vector<8x49xf32> -> vector<8x196xf32>
    %c0_2 = arith.constant 0 : index
    %c0_3 = arith.constant 0 : index
    %c0_4 = arith.constant 0 : index
    %3 = vector.load %arg1[%c0_2, %c0_3, %c0_4] : memref<16x8x196xbf16, #tpu.memory_space<vmem>>, vector<1x8x196xbf16>
    %4 = vector.shape_cast %3 : vector<1x8x196xbf16> to vector<8x196xbf16>
    %5 = arith.extf %4 : vector<8x196xbf16> to vector<8x196xf32>
    %6 = arith.mulf %5, %2 : vector<8x196xf32>
    %c1 = arith.constant 1 : index
    %c0_5 = arith.constant 0 : index
    %c0_6 = arith.constant 0 : index
    %7 = vector.load %arg2[%c1, %c0_5, %c0_6] : memref<16x8x49xf32, #tpu.memory_space<vmem>>, vector<1x8x49xf32>
    %8 = vector.shape_cast %7 : vector<1x8x49xf32> to vector<8x49xf32>
    %9 = tpu.concatenate %8, %8, %8, %8 in 1 : vector<8x49xf32>, vector<8x49xf32>, vector<8x49xf32>, vector<8x49xf32> -> vector<8x196xf32>
    %c1_7 = arith.constant 1 : index
    %c0_8 = arith.constant 0 : index
    %c0_9 = arith.constant 0 : index
    %10 = vector.load %arg1[%c1_7, %c0_8, %c0_9] : memref<16x8x196xbf16, #tpu.memory_space<vmem>>, vector<1x8x196xbf16>
    %11 = vector.shape_cast %10 : vector<1x8x196xbf16> to vector<8x196xbf16>
    %12 = arith.extf %11 : vector<8x196xbf16> to vector<8x196xf32>
    %13 = arith.mulf %12, %9 : vector<8x196xf32>
    %14 = arith.addf %6, %13 : vector<8x196xf32>
    %c2 = arith.constant 2 : index
    %c0_10 = arith.constant 0 : index
    %c0_11 = arith.constant 0 : index
    %15 = vector.load %arg2[%c2, %c0_10, %c0_11] : memref<16x8x49xf32, #tpu.memory_space<vmem>>, vector<1x8x49xf32>
    %16 = vector.shape_cast %15 : vector<1x8x49xf32> to vector<8x49xf32>
    %17 = tpu.concatenate %16, %16, %16, %16 in 1 : vector<8x49xf32>, vector<8x49xf32>, vector<8x49xf32>, vector<8x49xf32> -> vector<8x196xf32>
    %c2_12 = arith.constant 2 : index
    %c0_13 = arith.constant 0 : index
    %c0_14 = arith.constant 0 : index
    %18 = vector.load %arg1[%c2_12, %c0_13, %c0_14] : memref<16x8x196xbf16, #tpu.memory_space<vmem>>, vector<1x8x196xbf16>
    %19 = vector.shape_cast %18 : vector<1x8x196xbf16> to vector<8x196xbf16>
    %20 = arith.extf %19 : vector<8x196xbf16> to vector<8x196xf32>
    %21 = arith.mulf %20, %17 : vector<8x196xf32>
    %22 = arith.addf %14, %21 : vector<8x196xf32>
    %c3 = arith.constant 3 : index
    %c0_15 = arith.constant 0 : index
    %c0_16 = arith.constant 0 : index
    %23 = vector.load %arg2[%c3, %c0_15, %c0_16] : memref<16x8x49xf32, #tpu.memory_space<vmem>>, vector<1x8x49xf32>
    %24 = vector.shape_cast %23 : vector<1x8x49xf32> to vector<8x49xf32>
    %25 = tpu.concatenate %24, %24, %24, %24 in 1 : vector<8x49xf32>, vector<8x49xf32>, vector<8x49xf32>, vector<8x49xf32> -> vector<8x196xf32>
    %c3_17 = arith.constant 3 : index
    %c0_18 = arith.constant 0 : index
    %c0_19 = arith.constant 0 : index
    %26 = vector.load %arg1[%c3_17, %c0_18, %c0_19] : memref<16x8x196xbf16, #tpu.memory_space<vmem>>, vector<1x8x196xbf16>
    %27 = vector.shape_cast %26 : vector<1x8x196xbf16> to vector<8x196xbf16>
    %28 = arith.extf %27 : vector<8x196xbf16> to vector<8x196xf32>
    %29 = arith.mulf %28, %25 : vector<8x196xf32>
    %30 = arith.addf %22, %29 : vector<8x196xf32>
    %c4 = arith.constant 4 : index
    %c0_20 = arith.constant 0 : index
    %c0_21 = arith.constant 0 : index
    %31 = vector.load %arg2[%c4, %c0_20, %c0_21] : memref<16x8x49xf32, #tpu.memory_space<vmem>>, vector<1x8x49xf32>
    %32 = vector.shape_cast %31 : vector<1x8x49xf32> to vector<8x49xf32>
    %33 = tpu.concatenate %32, %32, %32, %32 in 1 : vector<8x49xf32>, vector<8x49xf32>, vector<8x49xf32>, vector<8x49xf32> -> vector<8x196xf32>
    %c4_22 = arith.constant 4 : index
    %c0_23 = arith.constant 0 : index
    %c0_24 = arith.constant 0 : index
    %34 = vector.load %arg1[%c4_22, %c0_23, %c0_24] : memref<16x8x196xbf16, #tpu.memory_space<vmem>>, vector<1x8x196xbf16>
    %35 = vector.shape_cast %34 : vector<1x8x196xbf16> to vector<8x196xbf16>
    %36 = arith.extf %35 : vector<8x196xbf16> to vector<8x196xf32>
    %37 = arith.mulf %36, %33 : vector<8x196xf32>
    %38 = arith.addf %30, %37 : vector<8x196xf32>
    %c5 = arith.constant 5 : index
    %c0_25 = arith.constant 0 : index
    %c0_26 = arith.constant 0 : index
    %39 = vector.load %arg2[%c5, %c0_25, %c0_26] : memref<16x8x49xf32, #tpu.memory_space<vmem>>, vector<1x8x49xf32>
    %40 = vector.shape_cast %39 : vector<1x8x49xf32> to vector<8x49xf32>
    %41 = tpu.concatenate %40, %40, %40, %40 in 1 : vector<8x49xf32>, vector<8x49xf32>, vector<8x49xf32>, vector<8x49xf32> -> vector<8x196xf32>
    %c5_27 = arith.constant 5 : index
    %c0_28 = arith.constant 0 : index
    %c0_29 = arith.constant 0 : index
    %42 = vector.load %arg1[%c5_27, %c0_28, %c0_29] : memref<16x8x196xbf16, #tpu.memory_space<vmem>>, vector<1x8x196xbf16>
    %43 = vector.shape_cast %42 : vector<1x8x196xbf16> to vector<8x196xbf16>
    %44 = arith.extf %43 : vector<8x196xbf16> to vector<8x196xf32>
    %45 = arith.mulf %44, %41 : vector<8x196xf32>
    %46 = arith.addf %38, %45 : vector<8x196xf32>
    %c6 = arith.constant 6 : index
    %c0_30 = arith.constant 0 : index
    %c0_31 = arith.constant 0 : index
    %47 = vector.load %arg2[%c6, %c0_30, %c0_31] : memref<16x8x49xf32, #tpu.memory_space<vmem>>, vector<1x8x49xf32>
    %48 = vector.shape_cast %47 : vector<1x8x49xf32> to vector<8x49xf32>
    %49 = tpu.concatenate %48, %48, %48, %48 in 1 : vector<8x49xf32>, vector<8x49xf32>, vector<8x49xf32>, vector<8x49xf32> -> vector<8x196xf32>
    %c6_32 = arith.constant 6 : index
    %c0_33 = arith.constant 0 : index
    %c0_34 = arith.constant 0 : index
    %50 = vector.load %arg1[%c6_32, %c0_33, %c0_34] : memref<16x8x196xbf16, #tpu.memory_space<vmem>>, vector<1x8x196xbf16>
    %51 = vector.shape_cast %50 : vector<1x8x196xbf16> to vector<8x196xbf16>
    %52 = arith.extf %51 : vector<8x196xbf16> to vector<8x196xf32>
    %53 = arith.mulf %52, %49 : vector<8x196xf32>
    %54 = arith.addf %46, %53 : vector<8x196xf32>
    %c7 = arith.constant 7 : index
    %c0_35 = arith.constant 0 : index
    %c0_36 = arith.constant 0 : index
    %55 = vector.load %arg2[%c7, %c0_35, %c0_36] : memref<16x8x49xf32, #tpu.memory_space<vmem>>, vector<1x8x49xf32>
    %56 = vector.shape_cast %55 : vector<1x8x49xf32> to vector<8x49xf32>
    %57 = tpu.concatenate %56, %56, %56, %56 in 1 : vector<8x49xf32>, vector<8x49xf32>, vector<8x49xf32>, vector<8x49xf32> -> vector<8x196xf32>
    %c7_37 = arith.constant 7 : index
    %c0_38 = arith.constant 0 : index
    %c0_39 = arith.constant 0 : index
    %58 = vector.load %arg1[%c7_37, %c0_38, %c0_39] : memref<16x8x196xbf16, #tpu.memory_space<vmem>>, vector<1x8x196xbf16>
    %59 = vector.shape_cast %58 : vector<1x8x196xbf16> to vector<8x196xbf16>
    %60 = arith.extf %59 : vector<8x196xbf16> to vector<8x196xf32>
    %61 = arith.mulf %60, %57 : vector<8x196xf32>
    %62 = arith.addf %54, %61 : vector<8x196xf32>
    %c8 = arith.constant 8 : index
    %c0_40 = arith.constant 0 : index
    %c0_41 = arith.constant 0 : index
    %63 = vector.load %arg2[%c8, %c0_40, %c0_41] : memref<16x8x49xf32, #tpu.memory_space<vmem>>, vector<1x8x49xf32>
    %64 = vector.shape_cast %63 : vector<1x8x49xf32> to vector<8x49xf32>
    %65 = tpu.concatenate %64, %64, %64, %64 in 1 : vector<8x49xf32>, vector<8x49xf32>, vector<8x49xf32>, vector<8x49xf32> -> vector<8x196xf32>
    %c8_42 = arith.constant 8 : index
    %c0_43 = arith.constant 0 : index
    %c0_44 = arith.constant 0 : index
    %66 = vector.load %arg1[%c8_42, %c0_43, %c0_44] : memref<16x8x196xbf16, #tpu.memory_space<vmem>>, vector<1x8x196xbf16>
    %67 = vector.shape_cast %66 : vector<1x8x196xbf16> to vector<8x196xbf16>
    %68 = arith.extf %67 : vector<8x196xbf16> to vector<8x196xf32>
    %69 = arith.mulf %68, %65 : vector<8x196xf32>
    %70 = arith.addf %62, %69 : vector<8x196xf32>
    %c9 = arith.constant 9 : index
    %c0_45 = arith.constant 0 : index
    %c0_46 = arith.constant 0 : index
    %71 = vector.load %arg2[%c9, %c0_45, %c0_46] : memref<16x8x49xf32, #tpu.memory_space<vmem>>, vector<1x8x49xf32>
    %72 = vector.shape_cast %71 : vector<1x8x49xf32> to vector<8x49xf32>
    %73 = tpu.concatenate %72, %72, %72, %72 in 1 : vector<8x49xf32>, vector<8x49xf32>, vector<8x49xf32>, vector<8x49xf32> -> vector<8x196xf32>
    %c9_47 = arith.constant 9 : index
    %c0_48 = arith.constant 0 : index
    %c0_49 = arith.constant 0 : index
    %74 = vector.load %arg1[%c9_47, %c0_48, %c0_49] : memref<16x8x196xbf16, #tpu.memory_space<vmem>>, vector<1x8x196xbf16>
    %75 = vector.shape_cast %74 : vector<1x8x196xbf16> to vector<8x196xbf16>
    %76 = arith.extf %75 : vector<8x196xbf16> to vector<8x196xf32>
    %77 = arith.mulf %76, %73 : vector<8x196xf32>
    %78 = arith.addf %70, %77 : vector<8x196xf32>
    %c10 = arith.constant 10 : index
    %c0_50 = arith.constant 0 : index
    %c0_51 = arith.constant 0 : index
    %79 = vector.load %arg2[%c10, %c0_50, %c0_51] : memref<16x8x49xf32, #tpu.memory_space<vmem>>, vector<1x8x49xf32>
    %80 = vector.shape_cast %79 : vector<1x8x49xf32> to vector<8x49xf32>
    %81 = tpu.concatenate %80, %80, %80, %80 in 1 : vector<8x49xf32>, vector<8x49xf32>, vector<8x49xf32>, vector<8x49xf32> -> vector<8x196xf32>
    %c10_52 = arith.constant 10 : index
    %c0_53 = arith.constant 0 : index
    %c0_54 = arith.constant 0 : index
    %82 = vector.load %arg1[%c10_52, %c0_53, %c0_54] : memref<16x8x196xbf16, #tpu.memory_space<vmem>>, vector<1x8x196xbf16>
    %83 = vector.shape_cast %82 : vector<1x8x196xbf16> to vector<8x196xbf16>
    %84 = arith.extf %83 : vector<8x196xbf16> to vector<8x196xf32>
    %85 = arith.mulf %84, %81 : vector<8x196xf32>
    %86 = arith.addf %78, %85 : vector<8x196xf32>
    %c11 = arith.constant 11 : index
    %c0_55 = arith.constant 0 : index
    %c0_56 = arith.constant 0 : index
    %87 = vector.load %arg2[%c11, %c0_55, %c0_56] : memref<16x8x49xf32, #tpu.memory_space<vmem>>, vector<1x8x49xf32>
    %88 = vector.shape_cast %87 : vector<1x8x49xf32> to vector<8x49xf32>
    %89 = tpu.concatenate %88, %88, %88, %88 in 1 : vector<8x49xf32>, vector<8x49xf32>, vector<8x49xf32>, vector<8x49xf32> -> vector<8x196xf32>
    %c11_57 = arith.constant 11 : index
    %c0_58 = arith.constant 0 : index
    %c0_59 = arith.constant 0 : index
    %90 = vector.load %arg1[%c11_57, %c0_58, %c0_59] : memref<16x8x196xbf16, #tpu.memory_space<vmem>>, vector<1x8x196xbf16>
    %91 = vector.shape_cast %90 : vector<1x8x196xbf16> to vector<8x196xbf16>
    %92 = arith.extf %91 : vector<8x196xbf16> to vector<8x196xf32>
    %93 = arith.mulf %92, %89 : vector<8x196xf32>
    %94 = arith.addf %86, %93 : vector<8x196xf32>
    %c12 = arith.constant 12 : index
    %c0_60 = arith.constant 0 : index
    %c0_61 = arith.constant 0 : index
    %95 = vector.load %arg2[%c12, %c0_60, %c0_61] : memref<16x8x49xf32, #tpu.memory_space<vmem>>, vector<1x8x49xf32>
    %96 = vector.shape_cast %95 : vector<1x8x49xf32> to vector<8x49xf32>
    %97 = tpu.concatenate %96, %96, %96, %96 in 1 : vector<8x49xf32>, vector<8x49xf32>, vector<8x49xf32>, vector<8x49xf32> -> vector<8x196xf32>
    %c12_62 = arith.constant 12 : index
    %c0_63 = arith.constant 0 : index
    %c0_64 = arith.constant 0 : index
    %98 = vector.load %arg1[%c12_62, %c0_63, %c0_64] : memref<16x8x196xbf16, #tpu.memory_space<vmem>>, vector<1x8x196xbf16>
    %99 = vector.shape_cast %98 : vector<1x8x196xbf16> to vector<8x196xbf16>
    %100 = arith.extf %99 : vector<8x196xbf16> to vector<8x196xf32>
    %101 = arith.mulf %100, %97 : vector<8x196xf32>
    %102 = arith.addf %94, %101 : vector<8x196xf32>
    %c13 = arith.constant 13 : index
    %c0_65 = arith.constant 0 : index
    %c0_66 = arith.constant 0 : index
    %103 = vector.load %arg2[%c13, %c0_65, %c0_66] : memref<16x8x49xf32, #tpu.memory_space<vmem>>, vector<1x8x49xf32>
    %104 = vector.shape_cast %103 : vector<1x8x49xf32> to vector<8x49xf32>
    %105 = tpu.concatenate %104, %104, %104, %104 in 1 : vector<8x49xf32>, vector<8x49xf32>, vector<8x49xf32>, vector<8x49xf32> -> vector<8x196xf32>
    %c13_67 = arith.constant 13 : index
    %c0_68 = arith.constant 0 : index
    %c0_69 = arith.constant 0 : index
    %106 = vector.load %arg1[%c13_67, %c0_68, %c0_69] : memref<16x8x196xbf16, #tpu.memory_space<vmem>>, vector<1x8x196xbf16>
    %107 = vector.shape_cast %106 : vector<1x8x196xbf16> to vector<8x196xbf16>
    %108 = arith.extf %107 : vector<8x196xbf16> to vector<8x196xf32>
    %109 = arith.mulf %108, %105 : vector<8x196xf32>
    %110 = arith.addf %102, %109 : vector<8x196xf32>
    %c14 = arith.constant 14 : index
    %c0_70 = arith.constant 0 : index
    %c0_71 = arith.constant 0 : index
    %111 = vector.load %arg2[%c14, %c0_70, %c0_71] : memref<16x8x49xf32, #tpu.memory_space<vmem>>, vector<1x8x49xf32>
    %112 = vector.shape_cast %111 : vector<1x8x49xf32> to vector<8x49xf32>
    %113 = tpu.concatenate %112, %112, %112, %112 in 1 : vector<8x49xf32>, vector<8x49xf32>, vector<8x49xf32>, vector<8x49xf32> -> vector<8x196xf32>
    %c14_72 = arith.constant 14 : index
    %c0_73 = arith.constant 0 : index
    %c0_74 = arith.constant 0 : index
    %114 = vector.load %arg1[%c14_72, %c0_73, %c0_74] : memref<16x8x196xbf16, #tpu.memory_space<vmem>>, vector<1x8x196xbf16>
    %115 = vector.shape_cast %114 : vector<1x8x196xbf16> to vector<8x196xbf16>
    %116 = arith.extf %115 : vector<8x196xbf16> to vector<8x196xf32>
    %117 = arith.mulf %116, %113 : vector<8x196xf32>
    %118 = arith.addf %110, %117 : vector<8x196xf32>
    %c15 = arith.constant 15 : index
    %c0_75 = arith.constant 0 : index
    %c0_76 = arith.constant 0 : index
    %119 = vector.load %arg2[%c15, %c0_75, %c0_76] : memref<16x8x49xf32, #tpu.memory_space<vmem>>, vector<1x8x49xf32>
    %120 = vector.shape_cast %119 : vector<1x8x49xf32> to vector<8x49xf32>
    %121 = tpu.concatenate %120, %120, %120, %120 in 1 : vector<8x49xf32>, vector<8x49xf32>, vector<8x49xf32>, vector<8x49xf32> -> vector<8x196xf32>
    %c15_77 = arith.constant 15 : index
    %c0_78 = arith.constant 0 : index
    %c0_79 = arith.constant 0 : index
    %122 = vector.load %arg1[%c15_77, %c0_78, %c0_79] : memref<16x8x196xbf16, #tpu.memory_space<vmem>>, vector<1x8x196xbf16>
    %123 = vector.shape_cast %122 : vector<1x8x196xbf16> to vector<8x196xbf16>
    %124 = arith.extf %123 : vector<8x196xbf16> to vector<8x196xf32>
    %125 = arith.mulf %124, %121 : vector<8x196xf32>
    %126 = arith.addf %118, %125 : vector<8x196xf32>
    %127 = arith.truncf %126 : vector<8x196xf32> to vector<8x196xbf16>
    %c0_80 = arith.constant 0 : index
    %c0_81 = arith.constant 0 : index
    %128 = vector.load %arg5[%c0_80, %c0_81] : memref<196x128xbf16, #tpu.memory_space<vmem>>, vector<196x128xbf16>
    %cst = arith.constant dense<0.000000e+00> : vector<8x128xf32>
    %129 = tpu.matmul %127, %128, %cst {dimension_numbers = #tpu.dot_dimension_numbers<[1], [0], [0], [1], [0, 0, 1, 1], [], []>} : vector<8x196xbf16>, vector<196x128xbf16>, vector<8x128xf32> -> vector<8x128xf32>
    %c0_82 = arith.constant 0 : index
    %c0_83 = arith.constant 0 : index
    %130 = vector.load %arg6[%c0_82, %c0_83] : memref<1x128xf32, #tpu.memory_space<vmem>>, vector<1x128xf32>
    %131 = vector.broadcast %130 : vector<1x128xf32> to vector<8x128xf32>
    %132 = arith.addf %129, %131 : vector<8x128xf32>
    %cst_84 = arith.constant 0.000000e+00 : f32
    %133 = vector.broadcast %cst_84 : f32 to vector<8x128xf32>
    %134 = arith.maximumf %132, %133 : vector<8x128xf32>
    %135 = arith.truncf %134 : vector<8x128xf32> to vector<8x128xbf16>
    %c0_85 = arith.constant 0 : index
    %c0_86 = arith.constant 0 : index
    %136 = vector.load %arg7[%c0_85, %c0_86] : memref<128x128xbf16, #tpu.memory_space<vmem>>, vector<128x128xbf16>
    %cst_87 = arith.constant dense<0.000000e+00> : vector<8x128xf32>
    %137 = tpu.matmul %135, %136, %cst_87 {dimension_numbers = #tpu.dot_dimension_numbers<[1], [0], [0], [1], [0, 0, 1, 1], [], []>} : vector<8x128xbf16>, vector<128x128xbf16>, vector<8x128xf32> -> vector<8x128xf32>
    %c0_88 = arith.constant 0 : index
    %c0_89 = arith.constant 0 : index
    %138 = vector.load %arg8[%c0_88, %c0_89] : memref<1x128xf32, #tpu.memory_space<vmem>>, vector<1x128xf32>
    %139 = vector.broadcast %138 : vector<1x128xf32> to vector<8x128xf32>
    %140 = arith.addf %137, %139 : vector<8x128xf32>
    %cst_90 = arith.constant 0.000000e+00 : f32
    %141 = vector.broadcast %cst_90 : f32 to vector<8x128xf32>
    %142 = arith.maximumf %140, %141 : vector<8x128xf32>
    %143 = arith.truncf %142 : vector<8x128xf32> to vector<8x128xbf16>
    %c0_91 = arith.constant 0 : index
    %c0_92 = arith.constant 0 : index
    %144 = vector.load %arg9[%c0_91, %c0_92] : memref<128x128xbf16, #tpu.memory_space<vmem>>, vector<128x128xbf16>
    %cst_93 = arith.constant dense<0.000000e+00> : vector<8x128xf32>
    %145 = tpu.matmul %143, %144, %cst_93 {dimension_numbers = #tpu.dot_dimension_numbers<[1], [0], [0], [1], [0, 0, 1, 1], [], []>} : vector<8x128xbf16>, vector<128x128xbf16>, vector<8x128xf32> -> vector<8x128xf32>
    %c0_94 = arith.constant 0 : index
    %c0_95 = arith.constant 0 : index
    %146 = vector.load %arg10[%c0_94, %c0_95] : memref<1x128xf32, #tpu.memory_space<vmem>>, vector<1x128xf32>
    %147 = vector.broadcast %146 : vector<1x128xf32> to vector<8x128xf32>
    %148 = arith.addf %145, %147 : vector<8x128xf32>
    %149 = tpu.iota {dimensions = array<i32: 1>} : vector<8x128xi32>
    %c5_i32 = arith.constant 5 : i32
    %150 = vector.broadcast %c5_i32 : i32 to vector<8x128xi32>
    %151 = arith.cmpi slt, %149, %150 : vector<8x128xi32>
    %cst_96 = arith.constant 0xFF800000 : f32
    %152 = vector.broadcast %cst_96 : f32 to vector<8x128xf32>
    %153 = arith.select %151, %148, %152 : vector<8x128xi1>, vector<8x128xf32>
    %cst_97 = arith.constant dense<0xFF800000> : vector<8xf32>
    %154 = vector.multi_reduction <maximumf>, %153, %cst_97 [1] : vector<8x128xf32> to vector<8xf32>
    %155 = vector.shape_cast %154 : vector<8xf32> to vector<8x1xf32>
    %156 = vector.broadcast %155 : vector<8x1xf32> to vector<8x128xf32>
    %157 = arith.subf %153, %156 : vector<8x128xf32>
    %158 = math.exp %157 : vector<8x128xf32>
    %cst_98 = arith.constant dense<0.000000e+00> : vector<8xf32>
    %159 = vector.multi_reduction <add>, %158, %cst_98 [1] : vector<8x128xf32> to vector<8xf32>
    %160 = vector.shape_cast %159 : vector<8xf32> to vector<8x1xf32>
    %161 = vector.broadcast %160 : vector<8x1xf32> to vector<8x128xf32>
    %162 = arith.divf %158, %161 : vector<8x128xf32>
    %c0_99 = arith.constant 0 : index
    %c0_100 = arith.constant 0 : index
    %163 = vector.load %arg11[%c0_99, %c0_100] : memref<8x128xf32, #tpu.memory_space<vmem>>, vector<8x128xf32>
    tpu.vector_store %arg11[%c0_99, %c0_100], %162 {strides = array<i32>} : memref<8x128xf32, #tpu.memory_space<vmem>>, vector<8x128xf32>,
    %c0_101 = arith.constant 0 : index
    %c0_102 = arith.constant 0 : index
    %164 = vector.load %arg3[%c0_101, %c0_102] : memref<8x4xf32, #tpu.memory_space<vmem>>, vector<8x4xf32>
    %165 = vector.extract_strided_slice %164 {offsets = [0, 2], sizes = [8, 1], strides = [1, 1]} : vector<8x4xf32> to vector<8x1xf32>
    %166 = vector.extract_strided_slice %164 {offsets = [0, 0], sizes = [8, 1], strides = [1, 1]} : vector<8x4xf32> to vector<8x1xf32>
    %167 = arith.subf %165, %166 : vector<8x1xf32>
    %168 = vector.extract_strided_slice %164 {offsets = [0, 3], sizes = [8, 1], strides = [1, 1]} : vector<8x4xf32> to vector<8x1xf32>
    %169 = vector.extract_strided_slice %164 {offsets = [0, 1], sizes = [8, 1], strides = [1, 1]} : vector<8x4xf32> to vector<8x1xf32>
    %170 = arith.subf %168, %169 : vector<8x1xf32>
    %171 = vector.extract_strided_slice %164 {offsets = [0, 0], sizes = [8, 1], strides = [1, 1]} : vector<8x4xf32> to vector<8x1xf32>
    %cst_103 = arith.constant 5.000000e-01 : f32
    %172 = vector.broadcast %cst_103 : f32 to vector<8x1xf32>
    %173 = arith.mulf %172, %167 : vector<8x1xf32>
    %174 = arith.addf %171, %173 : vector<8x1xf32>
    %175 = vector.extract_strided_slice %164 {offsets = [0, 1], sizes = [8, 1], strides = [1, 1]} : vector<8x4xf32> to vector<8x1xf32>
    %cst_104 = arith.constant 5.000000e-01 : f32
    %176 = vector.broadcast %cst_104 : f32 to vector<8x1xf32>
    %177 = arith.mulf %176, %170 : vector<8x1xf32>
    %178 = arith.addf %175, %177 : vector<8x1xf32>
    %179 = vector.extract_strided_slice %148 {offsets = [0, 5], sizes = [8, 5], strides = [1, 1]} : vector<8x128xf32> to vector<8x5xf32>
    %180 = vector.extract_strided_slice %148 {offsets = [0, 10], sizes = [8, 5], strides = [1, 1]} : vector<8x128xf32> to vector<8x5xf32>
    %181 = vector.extract_strided_slice %148 {offsets = [0, 15], sizes = [8, 5], strides = [1, 1]} : vector<8x128xf32> to vector<8x5xf32>
    %cst_105 = arith.constant 4.13516665 : f32
    %182 = vector.broadcast %cst_105 : f32 to vector<8x5xf32>
    %183 = arith.minimumf %181, %182 : vector<8x5xf32>
    %184 = vector.extract_strided_slice %148 {offsets = [0, 20], sizes = [8, 5], strides = [1, 1]} : vector<8x128xf32> to vector<8x5xf32>
    %cst_106 = arith.constant 4.13516665 : f32
    %185 = vector.broadcast %cst_106 : f32 to vector<8x5xf32>
    %186 = arith.minimumf %184, %185 : vector<8x5xf32>
    %187 = vector.broadcast %167 : vector<8x1xf32> to vector<8x5xf32>
    %188 = arith.mulf %179, %187 : vector<8x5xf32>
    %189 = vector.broadcast %174 : vector<8x1xf32> to vector<8x5xf32>
    %190 = arith.addf %188, %189 : vector<8x5xf32>
    %191 = vector.broadcast %170 : vector<8x1xf32> to vector<8x5xf32>
    %192 = arith.mulf %180, %191 : vector<8x5xf32>
    %193 = vector.broadcast %178 : vector<8x1xf32> to vector<8x5xf32>
    %194 = arith.addf %192, %193 : vector<8x5xf32>
    %195 = math.exp %183 : vector<8x5xf32>
    %196 = vector.broadcast %167 : vector<8x1xf32> to vector<8x5xf32>
    %197 = arith.mulf %195, %196 : vector<8x5xf32>
    %198 = math.exp %186 : vector<8x5xf32>
    %199 = vector.broadcast %170 : vector<8x1xf32> to vector<8x5xf32>
    %200 = arith.mulf %198, %199 : vector<8x5xf32>
    %cst_107 = arith.constant 5.000000e-01 : f32
    %201 = vector.broadcast %cst_107 : f32 to vector<8x5xf32>
    %202 = arith.mulf %201, %197 : vector<8x5xf32>
    %203 = arith.subf %190, %202 : vector<8x5xf32>
    %cst_108 = arith.constant 5.000000e-01 : f32
    %204 = vector.broadcast %cst_108 : f32 to vector<8x5xf32>
    %205 = arith.mulf %204, %200 : vector<8x5xf32>
    %206 = arith.subf %194, %205 : vector<8x5xf32>
    %cst_109 = arith.constant 5.000000e-01 : f32
    %207 = vector.broadcast %cst_109 : f32 to vector<8x5xf32>
    %208 = arith.mulf %207, %197 : vector<8x5xf32>
    %209 = arith.addf %190, %208 : vector<8x5xf32>
    %cst_110 = arith.constant 5.000000e-01 : f32
    %210 = vector.broadcast %cst_110 : f32 to vector<8x5xf32>
    %211 = arith.mulf %210, %200 : vector<8x5xf32>
    %212 = arith.addf %194, %211 : vector<8x5xf32>
    %c0_111 = arith.constant 0 : index
    %c0_112 = arith.constant 0 : index
    %213 = vector.load %arg4[%c0_111, %c0_112] : memref<8x2xf32, #tpu.memory_space<vmem>>, vector<8x1xf32>
    %c0_113 = arith.constant 0 : index
    %c1_114 = arith.constant 1 : index
    %214 = vector.load %arg4[%c0_113, %c1_114] : memref<8x2xf32, #tpu.memory_space<vmem>>, vector<8x1xf32>
    %cst_115 = arith.constant 0.000000e+00 : f32
    %215 = vector.broadcast %cst_115 : f32 to vector<8x5xf32>
    %216 = arith.maximumf %215, %203 : vector<8x5xf32>
    %217 = vector.broadcast %214 : vector<8x1xf32> to vector<8x5xf32>
    %218 = arith.minimumf %217, %216 : vector<8x5xf32>
    %cst_116 = arith.constant 0.000000e+00 : f32
    %219 = vector.broadcast %cst_116 : f32 to vector<8x5xf32>
    %220 = arith.maximumf %219, %209 : vector<8x5xf32>
    %221 = vector.broadcast %214 : vector<8x1xf32> to vector<8x5xf32>
    %222 = arith.minimumf %221, %220 : vector<8x5xf32>
    %cst_117 = arith.constant 0.000000e+00 : f32
    %223 = vector.broadcast %cst_117 : f32 to vector<8x5xf32>
    %224 = arith.maximumf %223, %206 : vector<8x5xf32>
    %225 = vector.broadcast %213 : vector<8x1xf32> to vector<8x5xf32>
    %226 = arith.minimumf %225, %224 : vector<8x5xf32>
    %cst_118 = arith.constant 0.000000e+00 : f32
    %227 = vector.broadcast %cst_118 : f32 to vector<8x5xf32>
    %228 = arith.maximumf %227, %212 : vector<8x5xf32>
    %229 = vector.broadcast %213 : vector<8x1xf32> to vector<8x5xf32>
    %230 = arith.minimumf %229, %228 : vector<8x5xf32>
    %cst_119 = arith.constant 0.000000e+00 : f32
    %231 = vector.broadcast %cst_119 : f32 to vector<8x108xf32>
    %232 = tpu.concatenate %218, %226, %222, %230, %231 in 1 : vector<8x5xf32>, vector<8x5xf32>, vector<8x5xf32>, vector<8x5xf32>, vector<8x108xf32> -> vector<8x128xf32>
    %c0_120 = arith.constant 0 : index
    %c0_121 = arith.constant 0 : index
    %233 = vector.load %arg12[%c0_120, %c0_121] : memref<8x128xf32, #tpu.memory_space<vmem>>, vector<8x128xf32>
    tpu.vector_store %arg12[%c0_120, %c0_121], %232 {strides = array<i32>} : memref<8x128xf32, #tpu.memory_space<vmem>>, vector<8x128xf32>,
    return
  }
  func.func @transform_0(%arg0: i32) -> (i32, i32, i32) {
    %c0_i32 = arith.constant 0 : i32
    %c0_i32_0 = arith.constant 0 : i32
    %c0_i32_1 = arith.constant 0 : i32
    return %c0_i32, %arg0, %c0_i32_0 : i32, i32, i32
  }
  func.func @transform_1(%arg0: i32) -> (i32, i32, i32) {
    %c0_i32 = arith.constant 0 : i32
    %c0_i32_0 = arith.constant 0 : i32
    %c0_i32_1 = arith.constant 0 : i32
    return %c0_i32, %arg0, %c0_i32_0 : i32, i32, i32
  }
  func.func @transform_2(%arg0: i32) -> (i32, i32) {
    %c0_i32 = arith.constant 0 : i32
    %c0_i32_0 = arith.constant 0 : i32
    return %arg0, %c0_i32 : i32, i32
  }
  func.func @transform_3(%arg0: i32) -> (i32, i32) {
    %c0_i32 = arith.constant 0 : i32
    %c0_i32_0 = arith.constant 0 : i32
    return %arg0, %c0_i32 : i32, i32
  }
  func.func @transform_4(%arg0: i32) -> (i32, i32) {
    %c0_i32 = arith.constant 0 : i32
    %c0_i32_0 = arith.constant 0 : i32
    %c0_i32_1 = arith.constant 0 : i32
    return %c0_i32, %c0_i32_0 : i32, i32
  }
  func.func @transform_5(%arg0: i32) -> (i32, i32) {
    %c0_i32 = arith.constant 0 : i32
    %c0_i32_0 = arith.constant 0 : i32
    %c0_i32_1 = arith.constant 0 : i32
    return %c0_i32, %c0_i32_0 : i32, i32
  }
  func.func @transform_6(%arg0: i32) -> (i32, i32) {
    %c0_i32 = arith.constant 0 : i32
    %c0_i32_0 = arith.constant 0 : i32
    %c0_i32_1 = arith.constant 0 : i32
    return %c0_i32, %c0_i32_0 : i32, i32
  }
  func.func @transform_7(%arg0: i32) -> (i32, i32) {
    %c0_i32 = arith.constant 0 : i32
    %c0_i32_0 = arith.constant 0 : i32
    %c0_i32_1 = arith.constant 0 : i32
    return %c0_i32, %c0_i32_0 : i32, i32
  }
  func.func @transform_8(%arg0: i32) -> (i32, i32) {
    %c0_i32 = arith.constant 0 : i32
    %c0_i32_0 = arith.constant 0 : i32
    %c0_i32_1 = arith.constant 0 : i32
    return %c0_i32, %c0_i32_0 : i32, i32
  }
  func.func @transform_9(%arg0: i32) -> (i32, i32) {
    %c0_i32 = arith.constant 0 : i32
    %c0_i32_0 = arith.constant 0 : i32
    %c0_i32_1 = arith.constant 0 : i32
    return %c0_i32, %c0_i32_0 : i32, i32
  }
  func.func @transform_10(%arg0: i32) -> (i32, i32) {
    %c0_i32 = arith.constant 0 : i32
    %c0_i32_0 = arith.constant 0 : i32
    return %arg0, %c0_i32 : i32, i32
  }
  func.func @transform_11(%arg0: i32) -> (i32, i32) {
    %c0_i32 = arith.constant 0 : i32
    %c0_i32_0 = arith.constant 0 : i32
    return %arg0, %c0_i32 : i32, i32
  }
}

</mosaic_0001>

<bundles_post_ra>
// kernel: tpu_custom_call.1
= control target key start
LH: loop header
LB: loop body
LE: loop exit
PB: predicated region body
PF: predicated region fallthrough
CT: control target
= control target key end

     0   :  { %7 = vsyncpa [#allocation3], 0  ;;  %s692_s0 = inlined_call_operand.hbm [shape: f32[8,128], index: 0, kind: input, shape index: {}]   ;;  %s693_s1 = inlined_call_operand.hbm [shape: f32[16,128], index: 1, kind: input, shape index: {}]   ;;  %s694_s2 = inlined_call_operand.hbm [shape: f32[16,128], index: 2, kind: output, shape index: {}]  }
   0x1   :  { %8 = vsyncpa [#allocation6], 0 }
   0x2   :  { %10 = vsyncpa [#allocation6 + $0x1], 0 }
   0x3   :  { %11 = vsyncpa [#allocation4], 0 }
   0x4   :  { %13 = vsyncpa [#allocation4 + $0x1], 0  ;;  %s491_s9 = smov 0   ;;  %s493_s10 = smov 0  }
   0x5   :  { %s495_s11 = smov 0   ;;  %s497_s12 = smov 0  }
   0x6 LB: > { %s512_s13 = sadd.s32 4294967295, %s471_s12   ;;  %s272_s14 = sadd.s32 4294967294, %s471_s12   ;;  %s471_s12 = sphi %s497_s12, %s718_s12   ;;  %s467_s11 = sphi %s495_s11, %s717_s11   ;;  %s463_s10 = sphi %s493_s10, %s716_s10   ;;  %s459_s9 = sphi %s491_s9, %s715_s9  }
   0x7   : > { %p60_p0 = scmp.ne.s32.totalorder %s463_s10, %s459_s9  ;;  %p695_p1 = scmp.eq.s32.totalorder %s512_s13, 0 }
   0x8   : > { %p90_p3 = scmp.eq.s32.totalorder %s272_s14, 1  ;;  %p273_p5 = scmp.ge.s32.totalorder %s471_s12, 1 }
   0x9   : > { %p521_p4 = por %p695_p1, %p60_p0  ;;  %p97_p7 = scmp.lt.s32.totalorder %s471_s12, 3 }
   0xa   : > { %p526_p6 = por %p90_p3, %p60_p0  ;;  %s473_s18 = smov [#allocation2]  }
   0xb   : > { %s698_s15 = scalar_select %p521_p4, 1, 0 }
   0xc   : > { %s699_s16 = scalar_select %p526_p6, 1, 0 }
   0xd   : > { %p531_p8 = pnand %p273_p5, %p97_p7  ;;  %s110_s19 = sshll.u32 %s473_s18, 4  ;;  %s111_s19 = int_to_ptr.vmem [resolvable:$true] %s110_s19 }
   0xe   : > { %s539_s20 = sadd.s32 1, %s471_s12   ;;  %s47_s24 = sadd.s32 1, %s467_s11 }
   0xf   : > { %s700_s17 = scalar_select %p531_p8, 1, 0 }
  0x10   : > { %p294_p10 = pneg %p531_p8  ;;  %s44_s22 = ssub.s32 %s471_s12, %s539_s20 }
  0x11   : > { %p549_p12 = scmp.eq.s32.totalorder %s44_s22, 0  ;;  %s343_s27 = scalar_lea.hbm %s692_s0, 128 }
  0x12   : > { %p543_p11 = pnand %p294_p10, %p695_p1  ;;  %p344_p0 = scmp.ne.s32.totalorder %s692_s0, %s343_s27 }
  0x13   : > { %s702_s23 = scalar_select %p549_p12, 1, 0 }
  0x14   : > { %p345_p3 = pneg %p543_p11  ;;  %p350_p10 = scmp.lt.u32.totalorder %s343_s27, %s692_s0 }
  0x16   : > { %p346_p5 = pnand %p345_p3, %p344_p0 }
  0x18   : > { %p347_p7 = pneg %p346_p5 }
  0x1a   : > { %p352_p9 = pnand %p350_p10, %p347_p7 }
  0x1c   : > { %355 = shalt.err (!%p352_p9)
}
  0x1d   : > { %s356_s4 = scalar_lea.vmem %s111_s19, 128  ;;  %p364_p6 = scmp.lt.s32.totalorder %s111_s19, %s111_s19 }
  0x1e   : > { %p357_p1 = scmp.ne.s32.totalorder %s111_s19, %s356_s4  ;;  %p365_p4 = scmp.lt.s32.totalorder %s356_s4, %s356_s4 }
  0x20   : > { %p359_p2 = pnand %p357_p1, %p345_p3  ;;  %p366_p8 = por %p365_p4, %p364_p6 }
  0x22   : > { %p360_p13 = pneg %p359_p2 }
  0x24   : > { %p367_p12 = pnand %p366_p8, %p360_p13 }
  0x26   : > { %370 = shalt.err (!%p367_p12)
}
  0x27   : > { %297 = dma.hbm_to_vmem [thread:$0]  (!%p543_p11), %s692_s0, 128, %s111_s19, [#allocation3]  }
  0x28   : > { %p703_p1 = scmp.ne.s32.totalorder %s702_s23, 0  ;;  %p55_p2 = scmp.eq.s32.totalorder %s471_s12, 0 }
  0x29   : > { %p704_p4 = scmp.ne.s32.totalorder %s467_s11, %s463_s10  ;;  %p705_p6 = scmp.eq.s32.totalorder %s512_s13, 1 }
  0x2a   : > { %s575_s7 = scalar_select %p703_p1, %s467_s11, %s47_s24  }
  0x2b   : > { %p583_p8 = por %p705_p6, %p704_p4  ;;  %p307_p9 = scmp.lt.s32.totalorder %s471_s12, 2 }
  0x2c   : > { %s121_s14 = sand.u32 1, %s467_s11   ;;  %p707_p12 = pmov %p704_p4 }
  0x2d   : > { %s276_s18 = sshll.u32 %s121_s14, 3  ;;  %s277_s21 = sshll.u32 %s471_s12, 7 }
  0x2e   : > { %p56_p13 = por %p55_p2, %p707_p12  ;;  %s596_s19 = scalar_lea.hbm %s693_s1, %s277_s21 }
  0x2f   : > { %s125_s23 = scalar_lea.vmem [#allocation5], %s276_s18  ;;  %s122_s27 = scalar_lea.sflag [#allocation6], %s121_s14 }
  0x30   : > { %s132_s24 = sshll.u32 %s125_s23, 4  ;;  %p598_p11 = pnand %p307_p9, %p56_p13  ;;  %s602_s24 = int_to_ptr.vmem [resolvable:$true] %s132_s24 }
  0x31   : > { %s371_s28 = scalar_lea.hbm %s596_s19, 128  ;;  %s376_s3 = scalar_lea.hbm %s693_s1, 256 }
  0x32   : > { %p372_p0 = scmp.ne.s32.totalorder %s596_s19, %s371_s28  ;;  %p373_p3 = pneg %p598_p11 }
  0x33   : > { %p377_p10 = scmp.lt.u32.totalorder %s596_s19, %s693_s1  ;;  %p378_p1 = scmp.lt.u32.totalorder %s376_s3, %s371_s28 }
  0x34   : > { %p374_p5 = pnand %p373_p3, %p372_p0  ;;  %p380_p4 = scmp.lt.u32.totalorder %s371_s28, %s596_s19 }
  0x35   : > { %p379_p2 = por %p378_p1, %p377_p10 }
  0x36   : > { %p375_p7 = pneg %p374_p5 }
  0x37   : > { %p381_p6 = por %p380_p4, %p379_p2 }
  0x39   : > { %p382_p9 = pnand %p381_p6, %p375_p7 }
  0x3b   : > { %385 = shalt.err (!%p382_p9)
}
  0x3c   : > { %s386_s6 = scalar_lea.vmem %s602_s24, 128  ;;  %s474_s14 = smov [#allocation5]  }
  0x3d   : > { %p387_p12 = scmp.ne.s32.totalorder %s602_s24, %s386_s6  ;;  %s391_s18 = sshll.u32 %s474_s14, 4  ;;  %s392_s18 = int_to_ptr.vmem [resolvable:$false] %s391_s18 }
  0x3e   : > { %s393_s21 = scalar_lea.vmem %s392_s18, 256  ;;  %p394_p5 = scmp.lt.s32.totalorder %s602_s24, %s392_s18 }
  0x3f   : > { %p389_p13 = pnand %p387_p12, %p373_p3  ;;  %p395_p10 = scmp.lt.s32.totalorder %s393_s21, %s386_s6 }
  0x41   : > { %p390_p0 = pneg %p389_p13  ;;  %p396_p1 = por %p395_p10, %p394_p5 }
  0x43   : > { %p397_p2 = pnand %p396_p1, %p390_p0 }
  0x45   : > { %400 = shalt.err (!%p397_p2)
}
  0x46   : > { %301 = dma.hbm_to_vmem [thread:$0]  (!%p598_p11), %s596_s19, 128, %s602_s24, %s122_s27  }
  0x47   : > { %p709_p7 = scmp.ne.s32.totalorder %s700_s17, 0 }
  0x48   : > { %p710_p3 = scmp.eq.s32.totalorder (!%p709_p7), %s512_s13, 0 }
  0x49   : > { %141 = sbr.rel (%p709_p7) target bundleno = 110 (0x6e), region = 28 }
  0x50   : > { %446 = dma.done.wait (%p710_p3), [#allocation3], 128   ;;  %p711_p4 = pmov %p710_p3 }
  0x51   : > { %s636_s22 = sand.u32 1, %s463_s10   ;;  %p712_p6 = scmp.ne.s32.totalorder %s698_s15, 0 }
  0x52   : > { %448 = vsyncadd (%p711_p4), [#allocation3], 4294967168  ;;  %s280_s25 = sshll.u32 %s636_s22, 3  ;;  %s148_s23 = scalar_lea.sflag [#allocation6], %s636_s22 }
  0x53   : > { %s151_s26 = scalar_lea.vmem [#allocation5], %s280_s25 }
  0x54   : > { %450 = dma.done.wait (%p712_p6), %s148_s23, 128  }
  0x55   : > { %452 = vsyncadd (%p712_p6), %s148_s23, 4294967168  ;;  %s171_s17 = scalar_lea.vmem [#allocation7], %s280_s25  ;;  %s283_s24 = sshll.u32 %s512_s13, 7  ;;  %v172_v0 = vld [vmem:[%s151_s26] sm:$0xff]  ;;  %v173_v1 = vld [vmem:[#allocation2] sm:$0xff] }
  0x56   : > { %s190_s19 = sshll.u32 %s171_s17, 4  ;;  %v174_v2 = vadd.f32 %v173_v1, %v172_v0  ;;  %s650_s29 = scalar_lea.hbm %s694_s2, %s283_s24  ;;  %s645_s19 = int_to_ptr.vmem [resolvable:$true] %s190_s19 }
  0x57   : > { %s177_s15 = scalar_lea.sflag [#allocation4], %s636_s22  ;;  %s401_s30 = scalar_lea.vmem %s645_s19, 128 }
  0x58   : > { %175 = vst [vmem:[%s171_s17] sm:$0xff] %v174_v2  ;;  %p402_p11 = scmp.ne.s32.totalorder %s645_s19, %s401_s30  ;;  %s475_s13 = smov [#allocation7]  }
  0x59   : > { %s405_s3 = sshll.u32 %s475_s13, 4  ;;  %s406_s3 = int_to_ptr.vmem [resolvable:$false] %s405_s3 }
  0x5a   : > { %p403_p9 = pnand %p402_p11, %p583_p8  ;;  %s407_s4 = scalar_lea.vmem %s406_s3, 256 }
  0x5b   : > { %p408_p13 = scmp.lt.s32.totalorder %s645_s19, %s406_s3  ;;  %p409_p0 = scmp.lt.s32.totalorder %s407_s4, %s401_s30 }
  0x5c   : > { %p404_p12 = pneg %p403_p9 }
  0x5d   : > { %p410_p5 = por %p409_p0, %p408_p13 }
  0x5f   : > { %p411_p10 = pnand %p410_p5, %p404_p12 }
  0x61   : > { %414 = shalt.err (!%p411_p10)
}
  0x62   : > { %s415_s5 = scalar_lea.hbm %s650_s29, 128  ;;  %s419_s18 = scalar_lea.hbm %s694_s2, 256 }
  0x63   : > { %p416_p1 = scmp.ne.s32.totalorder %s650_s29, %s415_s5  ;;  %p420_p3 = scmp.lt.u32.totalorder %s650_s29, %s694_s2 }
  0x64   : > { %p421_p4 = scmp.lt.u32.totalorder %s419_s18, %s415_s5  ;;  %p423_p11 = scmp.lt.u32.totalorder %s415_s5, %s650_s29 }
  0x65   : > { %p417_p2 = pnand %p416_p1, %p583_p8 }
  0x66   : > { %p422_p6 = por %p421_p4, %p420_p3 }
  0x67   : > { %p418_p7 = pneg %p417_p2 }
  0x68   : > { %p424_p9 = por %p423_p11, %p422_p6 }
  0x6a   : > { %p425_p12 = pnand %p424_p9, %p418_p7 }
  0x6c   : > { %428 = shalt.err (!%p425_p12)
}
  0x6d   : > { %292 = dma.vmem_to_hbm [thread:$0]  (%p583_p8), %s645_s19, 128, %s650_s29, %s177_s15  }
  0x6e PF: > { %s202_s25 = sand.u32 1, %s459_s9   ;;  %p713_p13 = scmp.ne.s32.totalorder %s699_s16, 0 }
  0x6f   : > { %p714_p0 = scmp.ge.s32.totalorder %s471_s12, 2  ;;  %s203_s23 = scalar_lea.sflag [#allocation4], %s202_s25 }
  0x71   : > { %p303_p5 = pnand %p714_p0, %p713_p13 }
  0x73   : > { %454 = dma.done.wait (!%p303_p5), %s203_s23, 128  }
  0x74   : > { %456 = vsyncadd (!%p303_p5), %s203_s23, 4294967168  ;;  %p16_p10 = scmp.ge.s32.totalorder %s539_s20, 4   ;;  %s715_s9 = smov %s463_s10 }
  0x75   : > { %s716_s10 = smov %s467_s11  ;;  %s717_s11 = smov %s575_s7 }
  0x76   : > { %s718_s12 = smov %s539_s20  ;;  %18 = sbr.rel (!%p16_p10) target bundleno = 6 (0x6), region = 78 }
  0x7d   :  { %208 = vsyncpa [#allocation3], 1 }
  0x7e   :  { %210 = vsyncpa [#allocation3 + $0x1], 1 }
  0x7f   :  { %211 = vsyncpa [#allocation6], 1 }
  0x80   :  { %213 = vsyncpa [#allocation6 + $0x1], 1 }
  0x81   :  { %214 = vsyncpa [#allocation4], 1 }
  0x82   :  { %216 = vsyncpa [#allocation4 + $0x1], 1 }

// kernel: _forward_core.1
= control target key start
LH: loop header
LB: loop body
LE: loop exit
PB: predicated region body
PF: predicated region fallthrough
CT: control target
= control target key end

     0   :  { %s1947_s17 = smov 0   ;;  %s1949_s18 = smov 0   ;;  %s2427_s0 = inlined_call_operand.vmem [shape: bf16[16,16,196], index: 0, kind: input, shape index: {}]   ;;  %s2428_s1 = inlined_call_operand.vmem [shape: f32[16,16,49], index: 1, kind: input, shape index: {}]   ;;  %s2429_s2 = inlined_call_operand.vmem [shape: f32[16,4], index: 2, kind: input, shape index: {}]   ;;  %s2430_s3 = inlined_call_operand.vmem [shape: f32[16,2], index: 3, kind: input, shape index: {}]   ;;  %s2431_s4 = inlined_call_operand.vmem [shape: bf16[196,128], index: 4, kind: input, shape index: {}]   ;;  %s2432_s5 = inlined_call_operand.vmem [shape: f32[1,128], index: 5, kind: input, shape index: {}]   ;;  %s2433_s6 = inlined_call_operand.vmem [shape: bf16[128,128], index: 6, kind: input, shape index: {}]   ;;  %s2434_s7 = inlined_call_operand.vmem [shape: f32[1,128], index: 7, kind: input, shape index: {}]   ;;  %s2435_s8 = inlined_call_operand.vmem [shape: bf16[128,128], index: 8, kind: input, shape index: {}]   ;;  %s2436_s9 = inlined_call_operand.vmem [shape: f32[1,128], index: 9, kind: input, shape index: {}]   ;;  %s2437_s10 = inlined_call_operand.vmem [shape: f32[16,128], index: 10, kind: output, shape index: {0}]   ;;  %s2438_s11 = inlined_call_operand.vmem [shape: f32[16,128], index: 11, kind: output, shape index: {1}]  }
   0x1   :  { %s1951_s19 = smov 0  }
   0x2 LB: > { %s1632_s20 = sadd.s32 4294967295, %s1871_s19   ;;  %s1964_s21 = sadd.s32 1, %s1871_s19   ;;  %s1871_s19 = sphi %s1951_s19, %s2442_s19   ;;  %s1867_s18 = sphi %s1949_s18, %s2441_s18   ;;  %s1863_s17 = sphi %s1947_s17, %s2440_s17  }
   0x3   : > { %s26_s22 = ssub.s32 %s1871_s19, %s1964_s21  ;;  %s29_s23 = sadd.s32 1, %s1867_s18 }
   0x4   : > { %p27_p0 = scmp.eq.s32.totalorder %s26_s22, 0  ;;  %p36_p1 = scmp.ne.s32.totalorder %s1867_s18, %s1863_s17 }
   0x5   : > { %p37_p2 = scmp.eq.s32.totalorder %s1871_s19, 0  ;;  %p1635_p4 = scmp.ge.s32.totalorder %s1871_s19, 2 }
   0x6   : > { %s1973_s24 = scalar_select %p27_p0, %s1867_s18, %s29_s23  }
   0x7   : > { %p1975_p3 = por %p37_p2, %p36_p1  ;;  %336 = sbr.rel (%p1635_p4) target bundleno = 38 (0x26), region = 40 }
   0xe   : > { %339 = sbr.rel (!%p1975_p3) target bundleno = 26 (0x1a), region = 44  ;;  %s341_s26 = sand.u32 (%p1975_p3), 1, %s1867_s18  }
   0xf   : > { %s1713_s27 = sshll.u32 (%p1975_p3), %s1871_s19, 3  ;;  %s1636_s28 = sshll.u32 (%p1975_p3), %s341_s26, 7 }
  0x10   : > { %s1987_s12 = scalar_lea.vmem (%p1975_p3), %s2427_s0, %s1713_s27  ;;  %s343_s13 = scalar_lea.vmem (%p1975_p3), [#allocation2], %s1636_s28 }
  0x11   : > { %v404_v0 = vld [vmem:[%s1987_s12] sm:$0xff] (%p1975_p3)  ;;  %v406_v1 = vld [vmem:[%s1987_s12 + $0x10] sm:$0xff] (%p1975_p3) }
  0x12   : > { %v408_v2 = vld [vmem:[%s1987_s12 + $0x20] sm:$0xff] (%p1975_p3)  ;;  %405 = vst [vmem:[%s343_s13] sm:$0xff] (%p1975_p3), %v404_v0  ;;  %407 = vst [vmem:[%s343_s13 + $0x8] sm:$0xff] (%p1975_p3), %v406_v1  ;;  %v410_v3 = vld [vmem:[%s1987_s12 + $0x30] sm:$0xff] (%p1975_p3) }
  0x13   : > { %409 = vst [vmem:[%s343_s13 + $0x10] sm:$0xff] (%p1975_p3), %v408_v2  ;;  %v412_v4 = vld [vmem:[%s1987_s12 + $0x40] sm:$0xff] (%p1975_p3)  ;;  %v414_v5 = vld [vmem:[%s1987_s12 + $0x50] sm:$0xff] (%p1975_p3)  ;;  %411 = vst [vmem:[%s343_s13 + $0x18] sm:$0xff] (%p1975_p3), %v410_v3 }
  0x14   : > { %413 = vst [vmem:[%s343_s13 + $0x20] sm:$0xff] (%p1975_p3), %v412_v4  ;;  %415 = vst [vmem:[%s343_s13 + $0x28] sm:$0xff] (%p1975_p3), %v414_v5  ;;  %v416_v6 = vld [vmem:[%s1987_s12 + $0x60] sm:$0xff] (%p1975_p3)  ;;  %v418_v7 = vld [vmem:[%s1987_s12 + $0x70] sm:$0xff] (%p1975_p3) }
  0x15   : > { %v420_v8 = vld [vmem:[%s1987_s12 + $0x80] sm:$0xff]  ;;  %417 = vst [vmem:[%s343_s13 + $0x30] sm:$0xff] %v416_v6  ;;  %419 = vst [vmem:[%s343_s13 + $0x38] sm:$0xff] %v418_v7  ;;  %v422_v9 = vld [vmem:[%s1987_s12 + $0x90] sm:$0xff] }
  0x16   : > { %421 = vst [vmem:[%s343_s13 + $0x40] sm:$0xff] %v420_v8  ;;  %v424_v10 = vld [vmem:[%s1987_s12 + $0xa0] sm:$0xff]  ;;  %v426_v11 = vld [vmem:[%s1987_s12 + $0xb0] sm:$0xff]  ;;  %423 = vst [vmem:[%s343_s13 + $0x48] sm:$0xff] %v422_v9 }
  0x17   : > { %425 = vst [vmem:[%s343_s13 + $0x50] sm:$0xff] %v424_v10  ;;  %427 = vst [vmem:[%s343_s13 + $0x58] sm:$0xff] %v426_v11  ;;  %v428_v12 = vld [vmem:[%s1987_s12 + $0xc0] sm:$0xff]  ;;  %v430_v13 = vld [vmem:[%s1987_s12 + $0xd0] sm:$0xff] }
  0x18   : > { %v432_v14 = vld [vmem:[%s1987_s12 + $0xe0] sm:$0xff]  ;;  %429 = vst [vmem:[%s343_s13 + $0x60] sm:$0xff] %v428_v12  ;;  %431 = vst [vmem:[%s343_s13 + $0x68] sm:$0xff] %v430_v13  ;;  %v434_v15 = vld [vmem:[%s1987_s12 + $0xf0] sm:$0xff] }
  0x19   : > { %433 = vst [vmem:[%s343_s13 + $0x70] sm:$0xff] %v432_v14  ;;  %435 = vst [vmem:[%s343_s13 + $0x78] sm:$0xff] %v434_v15 }
  0x1a PF: > { %441 = sbr.rel (!%p1975_p3) target bundleno = 38 (0x26), region = 82  ;;  %s443_s14 = sand.u32 (%p1975_p3), 1, %s1867_s18  }
  0x1b   : > { %s1640_s15 = sshll.u32 (%p1975_p3), %s1871_s19, 3  ;;  %s1639_s16 = sshll.u32 (%p1975_p3), %s443_s14, 7 }
  0x1c   : > { %s2012_s26 = scalar_lea.vmem (%p1975_p3), %s2428_s1, %s1640_s15  ;;  %s445_s25 = scalar_lea.vmem (%p1975_p3), [#allocation3], %s1639_s16 }
  0x1d   : > { %v505_v16 = vld [vmem:[%s2012_s26] sm:$0xff] (%p1975_p3)  ;;  %v507_v17 = vld [vmem:[%s2012_s26 + $0x10] sm:$0xff] (%p1975_p3) }
  0x1e   : > { %v509_v18 = vld [vmem:[%s2012_s26 + $0x20] sm:$0xff] (%p1975_p3)  ;;  %506 = vst [vmem:[%s445_s25] sm:$0xff] (%p1975_p3), %v505_v16  ;;  %508 = vst [vmem:[%s445_s25 + $0x8] sm:$0xff] (%p1975_p3), %v507_v17  ;;  %v511_v19 = vld [vmem:[%s2012_s26 + $0x30] sm:$0xff] (%p1975_p3) }
  0x1f   : > { %510 = vst [vmem:[%s445_s25 + $0x10] sm:$0xff] (%p1975_p3), %v509_v18  ;;  %v513_v20 = vld [vmem:[%s2012_s26 + $0x40] sm:$0xff] (%p1975_p3)  ;;  %v515_v21 = vld [vmem:[%s2012_s26 + $0x50] sm:$0xff] (%p1975_p3)  ;;  %512 = vst [vmem:[%s445_s25 + $0x18] sm:$0xff] (%p1975_p3), %v511_v19 }
  0x20   : > { %514 = vst [vmem:[%s445_s25 + $0x20] sm:$0xff] (%p1975_p3), %v513_v20  ;;  %516 = vst [vmem:[%s445_s25 + $0x28] sm:$0xff] (%p1975_p3), %v515_v21  ;;  %v517_v22 = vld [vmem:[%s2012_s26 + $0x60] sm:$0xff] (%p1975_p3)  ;;  %v519_v23 = vld [vmem:[%s2012_s26 + $0x70] sm:$0xff] (%p1975_p3) }
  0x21   : > { %v521_v24 = vld [vmem:[%s2012_s26 + $0x80] sm:$0xff]  ;;  %518 = vst [vmem:[%s445_s25 + $0x30] sm:$0xff] %v517_v22  ;;  %520 = vst [vmem:[%s445_s25 + $0x38] sm:$0xff] %v519_v23  ;;  %v523_v25 = vld [vmem:[%s2012_s26 + $0x90] sm:$0xff] }
  0x22   : > { %522 = vst [vmem:[%s445_s25 + $0x40] sm:$0xff] %v521_v24  ;;  %v525_v26 = vld [vmem:[%s2012_s26 + $0xa0] sm:$0xff]  ;;  %v527_v27 = vld [vmem:[%s2012_s26 + $0xb0] sm:$0xff]  ;;  %524 = vst [vmem:[%s445_s25 + $0x48] sm:$0xff] %v523_v25 }
  0x23   : > { %526 = vst [vmem:[%s445_s25 + $0x50] sm:$0xff] %v525_v26  ;;  %528 = vst [vmem:[%s445_s25 + $0x58] sm:$0xff] %v527_v27  ;;  %v529_v28 = vld [vmem:[%s2012_s26 + $0xc0] sm:$0xff]  ;;  %v531_v29 = vld [vmem:[%s2012_s26 + $0xd0] sm:$0xff] }
  0x24   : > { %v533_v30 = vld [vmem:[%s2012_s26 + $0xe0] sm:$0xff]  ;;  %530 = vst [vmem:[%s445_s25 + $0x60] sm:$0xff] %v529_v28  ;;  %532 = vst [vmem:[%s445_s25 + $0x68] sm:$0xff] %v531_v29  ;;  %v535_v31 = vld [vmem:[%s2012_s26 + $0xf0] sm:$0xff] }
  0x25   : > { %534 = vst [vmem:[%s445_s25 + $0x70] sm:$0xff] %v533_v30  ;;  %536 = vst [vmem:[%s445_s25 + $0x78] sm:$0xff] %v535_v31 }
  0x26 PF: > { %p1641_p5 = scmp.ge.s32.totalorder %s1871_s19, 1  ;;  %p555_p6 = scmp.lt.s32.totalorder %s1871_s19, 3 }
  0x28   : > { %p556_p7 = pnand %p1641_p5, %p555_p6 }
  0x29   : > { %s562_s27 = sand.u32 (!%p556_p7), 1, %s1863_s17   ;;  %s1873_s30 = smov (!%p556_p7), 19   ;;  %v1814_v39 = vld [vmem:[%s2431_s4] sm:$0xff] (!%p556_p7)   ;;  %v1876_v40 = vmov (!%p556_p7), 0   ;;  %v1815_v42 = vld [vmem:[%s2431_s4 + $0x8] sm:$0xff] (!%p556_p7)   ;;  %v1816_v43 = vld [vmem:[%s2431_s4 + $0x10] sm:$0xff] (!%p556_p7)  }
  0x2a   : > { %559 = sbr.rel (%p556_p7) target bundleno = 1224 (0x4c8), region = 128  ;;  %s2033_s28 = sshll.u32 (!%p556_p7), %s562_s27, 7  ;;  %1124 = vmatprep.subr.bf16.mxu0 (!%p556_p7), %v1876_v40  ;;  %v1817_v45 = vld [vmem:[%s2431_s4 + $0x18] sm:$0xff] (!%p556_p7)   ;;  %v1818_v47 = vld [vmem:[%s2431_s4 + $0x20] sm:$0xff] (!%p556_p7)   ;;  %v1819_v48 = vld [vmem:[%s2431_s4 + $0x28] sm:$0xff] (!%p556_p7)   ;;  %vm1120_vm0 = vcmask (!%p556_p7), 1041408  }
  0x2b   : > { %s2036_s29 = scalar_lea.vmem (!%p556_p7), [#allocation3], %s2033_s28  ;;  %s1874_s12 = smov (!%p556_p7), 49   ;;  %1125 = vmatpush1.bf16.msra.mxu0 (!%p556_p7), %v1814_v39  ;;  %v1820_v50 = vld [vmem:[%s2431_s4 + $0x30] sm:$0xff] (!%p556_p7)   ;;  %v1821_v52 = vld [vmem:[%s2431_s4 + $0x38] sm:$0xff] (!%p556_p7)   ;;  %v1822_v53 = vld [vmem:[%s2431_s4 + $0x40] sm:$0xff] (!%p556_p7)   ;;  %v1877_v0 = vmov (!%p556_p7), 0.0  }
  0x2c   : > { %v2039_v32 = vld [vmem:[%s2036_s29] sm:$0xff] (!%p556_p7)  ;;  %v2046_v33 = vld [vmem:[%s2036_s29 + $0x8] sm:$0xff] (!%p556_p7)  ;;  %s1875_s17 = smov (!%p556_p7), 98   ;;  %v2053_v34 = vld [vmem:[%s2036_s29 + $0x10] sm:$0xff] (!%p556_p7)  ;;  %1126 = vmatprep.subr.bf16.mxu0 (!%p556_p7), %v1876_v40  ;;  %1732 = vmatprep.subr.bf16.mxu1 (!%p556_p7), %v1877_v0  ;;  %s2260_s25 = scalar_lea.vmem (!%p556_p7), [#allocation2], %s2033_s28  ;;  %vm651_vm1 = vcmask (!%p556_p7), 400384  }
  0x2d   : > { %648 = vrot.lane.b32.xlu1 (!%p556_p7), %v2039_v32, %s1873_s30  ;;  %642 = vrot.lane.b32.xlu0 (!%p556_p7), %v2039_v32, %s1874_s12  ;;  %v2060_v35 = vld [vmem:[%s2036_s29 + $0x18] sm:$0xff] (!%p556_p7)  ;;  %v2071_v36 = vld [vmem:[%s2036_s29 + $0x20] sm:$0xff] (!%p556_p7)  ;;  %vm653_vm2 = vcmask (!%p556_p7), 801792   ;;  %vm655_vm3 = vcmask (!%p556_p7), 154624   ;;  %vm1116_vm4 = vcmask (!%p556_p7), 556032   ;;  %vm1878_vm5 = vmmov (!%p556_p7), 0  }
  0x2e   : > { %v2078_v37 = vld [vmem:[%s2036_s29 + $0x28] sm:$0xff] (!%p556_p7)  ;;  %v2093_v38 = vld [vmem:[%s2036_s29 + $0x30] sm:$0xff] (!%p556_p7)  ;;  %v2104_v41 = vld [vmem:[%s2036_s29 + $0x38] sm:$0xff] (!%p556_p7)  ;;  %1748 = vmatprep.mubr.msk.bf16.mxu1 (!%p556_p7), %vm1878_vm5, %v1877_v0  ;;  %p623_p8 = scmp.lt.s32.totalorder (!%p556_p7), %s1632_s20, 1  ;;  %s1879_s22 = smov (!%p556_p7), 2   ;;  %vm1491_vm7 = vcmask (!%p556_p7), 39936  }
  0x2f   : > { %1127 = vmatpush1.bf16.msra.mxu0 (!%p556_p7), %v1815_v42  ;;  %v2123_v44 = vld [vmem:[%s2036_s29 + $0x40] sm:$0xff] (!%p556_p7)  ;;  %v2134_v46 = vld [vmem:[%s2036_s29 + $0x48] sm:$0xff] (!%p556_p7)  ;;  %v2153_v49 = vld [vmem:[%s2036_s29 + $0x50] sm:$0xff] (!%p556_p7)  ;;  %vm1493_vm8 = vcmask (!%p556_p7), 80896   ;;  %vm1495_vm9 = vcmask (!%p556_p7), 121856   ;;  %vm1497_vm10 = vcmask (!%p556_p7), 162816  }
  0x30   : > { %1128 = vmatprep.subr.bf16.mxu0 (!%p556_p7), %v1876_v40  ;;  %v2164_v51 = vld [vmem:[%s2036_s29 + $0x58] sm:$0xff] (!%p556_p7)  ;;  %v2183_v54 = vld [vmem:[%s2036_s29 + $0x60] sm:$0xff] (!%p556_p7)  ;;  %v1823_v55 = vld [vmem:[%s2431_s4 + $0x48] sm:$0xff] (!%p556_p7)  }
  0x31   : > { %665 = vrot.lane.b32.xlu1 %v2046_v33, %s1874_s12  ;;  %645 = vrot.lane.b32.xlu0 %v2039_v32, %s1875_s17  ;;  %v2194_v56 = vld [vmem:[%s2036_s29 + $0x68] sm:$0xff]  ;;  %v1824_v57 = vld [vmem:[%s2431_s4 + $0x50] sm:$0xff]   ;;  %s2444_s20 = smov (!%p623_p8, %s1632_s20), 1 }
  0x32   : > { %v1825_v58 = vld [vmem:[%s2431_s4 + $0x58] sm:$0xff]   ;;  %v1826_v59 = vld [vmem:[%s2431_s4 + $0x60] ss:$0 sps:$4 sm:$0x33]   ;;  %v2216_v60 = vld [vmem:[%s2036_s29 + $0x70] sm:$0xff]  ;;  %s2356_s15 = sshll.u32 %s2444_s20, 3 }
  0x33   : > { %1129 = vmatpush1.bf16.msra.mxu0 %v1816_v43  ;;  %v1122_v61 = vsel %vm1120_vm0, %v1826_v59, 0  ;;  %v2224_v62 = vld [vmem:[%s2036_s29 + $0x78] sm:$0xff]  ;;  %v1827_v63 = vld [vmem:[%s2433_s6] sm:$0xff]   ;;  %v1828_v1 = vld [vmem:[%s2433_s6 + $0x8] sm:$0xff]   ;;  %s626_s16 = scalar_lea.vmem %s2429_s2, %s2356_s15  ;;  %s1884_s29 = smov 118  }
  0x34   : > { %1130 = vmatprep.subr.bf16.mxu0 %v1876_v40  ;;  %1733 = vmatpush3.bf16.msra.mxu1 %v1827_v63  ;;  %v1829_v2 = vld [vmem:[%s2433_s6 + $0x10] sm:$0xff]   ;;  %v1830_v3 = vld [vmem:[%s2433_s6 + $0x18] sm:$0xff]   ;;  %v1831_v4 = vld [vmem:[%s2433_s6 + $0x20] sm:$0xff]   ;;  %s638_s23 = scalar_lea.vmem %s2438_s11, %s2356_s15 }
  0x35   : > { %671 = vrot.lane.b32.xlu1 %v2046_v33, %s1873_s30  ;;  %668 = vrot.lane.b32.xlu0 %v2046_v33, %s1875_s17  ;;  %v1832_v5 = vld [vmem:[%s2433_s6 + $0x28] sm:$0xff]   ;;  %v657_v6 = vld [vmem:[%s2260_s25] sm:$0xff] }
  0x36   : > { %1734 = vmatprep.subr.bf16.mxu1 %v1877_v0  ;;  %v658_v9 = vunpack.c.l.bf16 %v657_v6  ;;  %v659_v10 = vunpack.c.h.bf16 %v657_v6  ;;  %v1649_v11 = vld [vmem:[%s2260_s25 + $0x8] sm:$0xff]  ;;  %v1651_v24 = vld [vmem:[%s2260_s25 + $0x10] sm:$0xff] }
  0x37   : > { %1131 = vmatpush1.bf16.msra.mxu0 %v1817_v45  ;;  %v679_v19 = vunpack.c.l.bf16 %v1649_v11  ;;  %v680_v20 = vunpack.c.h.bf16 %v1649_v11  ;;  %v702_v29 = vunpack.c.l.bf16 %v1651_v24  ;;  %v703_v43 = vunpack.c.h.bf16 %v1651_v24 }
  0x38   : > { %1132 = vmatprep.subr.bf16.mxu0 %v1876_v40  ;;  %1735 = vmatpush3.bf16.msra.mxu1 %v1828_v1  ;;  %v1655_v1 = vld [vmem:[%s2260_s25 + $0x20] sm:$0xff] }
  0x39   : > { %691 = vrot.lane.b32.xlu1 %v2053_v34, %s1875_s17  ;;  %688 = vrot.lane.b32.xlu0 %v2053_v34, %s1874_s12  ;;  %v748_v6 = vunpack.c.l.bf16 %v1655_v1 }
  0x3a   : > { %1736 = vmatprep.subr.bf16.mxu1 %v1877_v0 }
  0x3b   : > { %1133 = vmatpush1.bf16.msra.mxu0 %v1818_v47  ;;  %v1653_v47 = vld [vmem:[%s2260_s25 + $0x18] sm:$0xff] }
  0x3c   : > { %1134 = vmatprep.subr.bf16.mxu0 %v1876_v40  ;;  %1737 = vmatpush3.bf16.msra.mxu1 %v1829_v2 }
  0x3d   : > { %711 = vrot.lane.b32.xlu1 %v2060_v35, %s1874_s12  ;;  %694 = vrot.lane.b32.xlu0 %v2053_v34, %s1873_s30 }
  0x3e   : > { %1738 = vmatprep.subr.bf16.mxu1 %v1877_v0 }
  0x3f   : > { %1135 = vmatpush1.bf16.msra.mxu0 %v1819_v48 }
  0x40   : > { %1136 = vmatprep.subr.bf16.mxu0 %v1876_v40  ;;  %1739 = vmatpush3.bf16.msra.mxu1 %v1830_v3 }
  0x41   : > { %717 = vrot.lane.b32.xlu1 %v2060_v35, %s1873_s30  ;;  %714 = vrot.lane.b32.xlu0 %v2060_v35, %s1875_s17 }
  0x42   : > { %1740 = vmatprep.subr.bf16.mxu1 %v1877_v0 }
  0x43   : > { %1137 = vmatpush1.bf16.msra.mxu0 %v1820_v50 }
  0x44   : > { %1138 = vmatprep.subr.bf16.mxu0 %v1876_v40  ;;  %1741 = vmatpush3.bf16.msra.mxu1 %v1831_v4 }
  0x45   : > { %737 = vrot.lane.b32.xlu1 %v2071_v36, %s1875_s17  ;;  %734 = vrot.lane.b32.xlu0 %v2071_v36, %s1874_s12 }
  0x46   : > { %1742 = vmatprep.subr.bf16.mxu1 %v1877_v0 }
  0x47   : > { %1139 = vmatpush1.bf16.msra.mxu0 %v1821_v52 }
  0x48   : > { %1140 = vmatprep.subr.bf16.mxu0 %v1876_v40  ;;  %1743 = vmatpush3.bf16.msra.mxu1 %v1832_v5 }
  0x49   : > { %757 = vrot.lane.b32.xlu1 %v2078_v37, %s1874_s12  ;;  %740 = vrot.lane.b32.xlu0 %v2071_v36, %s1873_s30 }
  0x4a   : > { %1744 = vmatprep.subr.bf16.mxu1 %v1877_v0 }
  0x4b   : > { %1141 = vmatpush1.bf16.msra.mxu0 %v1822_v53 }
  0x4c   : > { %1142 = vmatprep.subr.bf16.mxu0 %v1876_v40 }
  0x4d   : > { %763 = vrot.lane.b32.xlu1 %v2078_v37, %s1873_s30  ;;  %760 = vrot.lane.b32.xlu0 %v2078_v37, %s1875_s17 }
  0x4f   : > { %1143 = vmatpush1.bf16.msra.mxu0 %v1823_v55 }
  0x50   : > { %1144 = vmatprep.subr.bf16.mxu0 %v1876_v40 }
  0x51   : > { %783 = vrot.lane.b32.xlu1 %v2093_v38, %s1875_s17  ;;  %780 = vrot.lane.b32.xlu0 %v2093_v38, %s1874_s12 }
  0x53   : > { %1145 = vmatpush1.bf16.msra.mxu0 %v1824_v57  ;;  %v725_v57 = vunpack.c.l.bf16 %v1653_v47 }
  0x54   : > { %1146 = vmatprep.subr.bf16.mxu0 %v1876_v40 }
  0x55   : > { %803 = vrot.lane.b32.xlu1 %v2104_v41, %s1874_s12  ;;  %786 = vrot.lane.b32.xlu0 %v2093_v38, %s1873_s30 }
  0x57   : > { %1147 = vmatpush1.bf16.msra.mxu0 %v1825_v58  ;;  %v726_v58 = vunpack.c.h.bf16 %v1653_v47  ;;  %v1661_v47 = vld [vmem:[%s2260_s25 + $0x38] sm:$0xff] }
  0x58   : > { %1148 = vmatprep.subr.bf16.mxu0 %v1876_v40 }
  0x59   : > { %809 = vrot.lane.b32.xlu1 %v2104_v41, %s1873_s30  ;;  %806 = vrot.lane.b32.xlu0 %v2104_v41, %s1875_s17 }
  0x5b   : > { %1149 = vmatpush1.bf16.msra.mxu0 %v1122_v61 }
  0x5d   : > { %829 = vrot.lane.b32.xlu1 %v2123_v44, %s1875_s17  ;;  %826 = vrot.lane.b32.xlu0 %v2123_v44, %s1874_s12 }
  0x61   : > { %849 = vrot.lane.b32.xlu1 %v2134_v46, %s1874_s12  ;;  %832 = vrot.lane.b32.xlu0 %v2123_v44, %s1873_s30 }
  0x65   : > { %855 = vrot.lane.b32.xlu1 %v2134_v46, %s1873_s30  ;;  %852 = vrot.lane.b32.xlu0 %v2134_v46, %s1875_s17 }
  0x69   : > { %875 = vrot.lane.b32.xlu1 %v2153_v49, %s1875_s17  ;;  %872 = vrot.lane.b32.xlu0 %v2153_v49, %s1874_s12 }
  0x6d   : > { %895 = vrot.lane.b32.xlu1 %v2164_v51, %s1874_s12  ;;  %878 = vrot.lane.b32.xlu0 %v2153_v49, %s1873_s30 }
  0x71   : > { %901 = vrot.lane.b32.xlu1 %v2164_v51, %s1873_s30  ;;  %898 = vrot.lane.b32.xlu0 %v2164_v51, %s1875_s17 }
  0x75   : > { %921 = vrot.lane.b32.xlu1 %v2183_v54, %s1875_s17  ;;  %918 = vrot.lane.b32.xlu0 %v2183_v54, %s1874_s12 }
  0x79   : > { %941 = vrot.lane.b32.xlu1 %v2194_v56, %s1874_s12  ;;  %924 = vrot.lane.b32.xlu0 %v2183_v54, %s1873_s30 }
  0x7d   : > { %947 = vrot.lane.b32.xlu1 %v2194_v56, %s1873_s30  ;;  %944 = vrot.lane.b32.xlu0 %v2194_v56, %s1875_s17 }
  0x81   : > { %967 = vrot.lane.b32.xlu1 %v2216_v60, %s1875_s17  ;;  %964 = vrot.lane.b32.xlu0 %v2216_v60, %s1874_s12 }
  0x85   : > { %987 = vrot.lane.b32.xlu1 %v2224_v62, %s1874_s12  ;;  %970 = vrot.lane.b32.xlu0 %v2216_v60, %s1873_s30  ;;  %s1885_s12 = smov 123  }
  0x89   : > { %993 = vrot.lane.b32.xlu1 %v2224_v62, %s1873_s30  ;;  %990 = vrot.lane.b32.xlu0 %v2224_v62, %s1875_s17  ;;  %s1880_s17 = smov 126  }
  0x9f   : > { %v649_v7 = vpop.permute.xlu1 %648  ;;  %v643_v8 = vpop.permute.xlu0 %642 }
  0xa0   : > { %v652_v12 = vsel %vm651_vm1, %v2039_v32, %v643_v8 }
  0xa3   : > { %v666_v13 = vpop.permute.xlu1 %665  ;;  %v646_v14 = vpop.permute.xlu0 %645 }
  0xa4   : > { %v654_v15 = vsel %vm653_vm2, %v652_v12, %v646_v14  ;;  %v656_v16 = vsel %vm655_vm3, %v646_v14, %v649_v7  ;;  %v674_v21 = vsel %vm651_vm1, %v2046_v33, %v666_v13  ;;  %v749_v12 = vunpack.c.h.bf16 %v1655_v1  ;;  %v1657_v14 = vld [vmem:[%s2260_s25 + $0x28] sm:$0xff] }
  0xa5   : > { %v660_v17 = vmul.f32 %v658_v9, %v654_v15  ;;  %v661_v18 = vmul.f32 %v659_v10, %v656_v16 }
  0xa7   : > { %v672_v22 = vpop.permute.xlu1 %671  ;;  %v669_v23 = vpop.permute.xlu0 %668 }
  0xa8   : > { %v675_v25 = vsel %vm653_vm2, %v674_v21, %v669_v23  ;;  %v676_v26 = vsel %vm655_vm3, %v669_v23, %v672_v22  ;;  %v772_v21 = vunpack.c.h.bf16 %v1657_v14 }
  0xa9   : > { %v681_v27 = vmul.f32 %v679_v19, %v675_v25  ;;  %v682_v28 = vmul.f32 %v680_v20, %v676_v26  ;;  %v771_v20 = vunpack.c.l.bf16 %v1657_v14  ;;  %v1659_v25 = vld [vmem:[%s2260_s25 + $0x30] sm:$0xff] }
  0xab   : > { %v683_v30 = vadd.f32 %v681_v27, %v660_v17  ;;  %v684_v31 = vadd.f32 %v682_v28, %v661_v18  ;;  %v692_v32 = vpop.permute.xlu1 %691  ;;  %v689_v39 = vpop.permute.xlu0 %688 }
  0xac   : > { %v697_v42 = vsel %vm651_vm1, %v2053_v34, %v689_v39 }
  0xad   : > { %v698_v33 = vsel %vm653_vm2, %v697_v42, %v692_v32 }
  0xae   : > { %v704_v45 = vmul.f32 %v702_v29, %v698_v33 }
  0xaf   : > { %v712_v48 = vpop.permute.xlu1 %711  ;;  %v695_v50 = vpop.permute.xlu0 %694 }
  0xb0   : > { %v699_v52 = vsel %vm655_vm3, %v692_v32, %v695_v50  ;;  %v706_v53 = vadd.f32 %v704_v45, %v683_v30  ;;  %v720_v59 = vsel %vm651_vm1, %v2060_v35, %v712_v48  ;;  %v794_v30 = vunpack.c.l.bf16 %v1659_v25 }
  0xb1   : > { %v705_v55 = vmul.f32 %v703_v43, %v699_v52  ;;  %v795_v43 = vunpack.c.h.bf16 %v1659_v25 }
  0xb3   : > { %v707_v61 = vadd.f32 %v705_v55, %v684_v31  ;;  %v718_v63 = vpop.permute.xlu1 %717  ;;  %v715_v34 = vpop.permute.xlu0 %714 }
  0xb4   : > { %v721_v2 = vsel %vm653_vm2, %v720_v59, %v715_v34  ;;  %v722_v3 = vsel %vm655_vm3, %v715_v34, %v718_v63  ;;  %v1663_v34 = vld [vmem:[%s2260_s25 + $0x40] sm:$0xff] }
  0xb5   : > { %v727_v4 = vmul.f32 %v725_v57, %v721_v2  ;;  %v728_v5 = vmul.f32 %v726_v58, %v722_v3  ;;  %v817_v57 = vunpack.c.l.bf16 %v1661_v47  ;;  %v818_v58 = vunpack.c.h.bf16 %v1661_v47 }
  0xb7   : > { %v729_v7 = vadd.f32 %v727_v4, %v706_v53  ;;  %v730_v8 = vadd.f32 %v728_v5, %v707_v61  ;;  %v738_v9 = vpop.permute.xlu1 %737  ;;  %v735_v10 = vpop.permute.xlu0 %734  ;;  %v840_v5 = vunpack.c.l.bf16 %v1663_v34 }
  0xb8   : > { %v743_v11 = vsel %vm651_vm1, %v2071_v36, %v735_v10 }
  0xb9   : > { %v744_v35 = vsel %vm653_vm2, %v743_v11, %v738_v9  ;;  %v841_v11 = vunpack.c.h.bf16 %v1663_v34 }
  0xba   : > { %v750_v13 = vmul.f32 %v748_v6, %v744_v35 }
  0xbb   : > { %v758_v15 = vpop.permute.xlu1 %757  ;;  %v741_v16 = vpop.permute.xlu0 %740 }
  0xbc   : > { %v745_v17 = vsel %vm655_vm3, %v738_v9, %v741_v16  ;;  %v752_v18 = vadd.f32 %v750_v13, %v729_v7  ;;  %v766_v22 = vsel %vm651_vm1, %v2078_v37, %v758_v15 }
  0xbd   : > { %v751_v19 = vmul.f32 %v749_v12, %v745_v17  ;;  %v1665_v12 = vld [vmem:[%s2260_s25 + $0x48] sm:$0xff] }
  0xbf   : > { %v753_v23 = vadd.f32 %v751_v19, %v730_v8  ;;  %v764_v24 = vpop.permute.xlu1 %763  ;;  %v761_v36 = vpop.permute.xlu0 %760  ;;  %v864_v19 = vunpack.c.h.bf16 %v1665_v12 }
  0xc0   : > { %v767_v26 = vsel %vm653_vm2, %v766_v22, %v761_v36  ;;  %v768_v27 = vsel %vm655_vm3, %v761_v36, %v764_v24 }
  0xc1   : > { %v773_v28 = vmul.f32 %v771_v20, %v767_v26  ;;  %v774_v29 = vmul.f32 %v772_v21, %v768_v27 }
  0xc3   : > { %v775_v31 = vadd.f32 %v773_v28, %v752_v18  ;;  %v776_v32 = vadd.f32 %v774_v29, %v753_v23  ;;  %v784_v39 = vpop.permute.xlu1 %783  ;;  %v781_v42 = vpop.permute.xlu0 %780  ;;  %v863_v18 = vunpack.c.l.bf16 %v1665_v12  ;;  %v1667_v23 = vld [vmem:[%s2260_s25 + $0x50] sm:$0xff] }
  0xc4   : > { %v789_v33 = vsel %vm651_vm1, %v2093_v38, %v781_v42  ;;  %v886_v27 = vunpack.c.l.bf16 %v1667_v23 }
  0xc5   : > { %v790_v37 = vsel %vm653_vm2, %v789_v33, %v784_v39  ;;  %v1669_v33 = vld [vmem:[%s2260_s25 + $0x58] sm:$0xff] }
  0xc6   : > { %v796_v45 = vmul.f32 %v794_v30, %v790_v37 }
  0xc7   : > { %v804_v48 = vpop.permute.xlu1 %803  ;;  %v787_v50 = vpop.permute.xlu0 %786 }
  0xc8   : > { %v791_v52 = vsel %vm655_vm3, %v784_v39, %v787_v50  ;;  %v798_v53 = vadd.f32 %v796_v45, %v775_v31  ;;  %v812_v59 = vsel %vm651_vm1, %v2104_v41, %v804_v48  ;;  %v887_v39 = vunpack.c.h.bf16 %v1667_v23 }
  0xc9   : > { %v797_v55 = vmul.f32 %v795_v43, %v791_v52  ;;  %v909_v50 = vunpack.c.l.bf16 %v1669_v33  ;;  %v910_v52 = vunpack.c.h.bf16 %v1669_v33 }
  0xcb   : > { %v799_v61 = vadd.f32 %v797_v55, %v776_v32  ;;  %v810_v63 = vpop.permute.xlu1 %809  ;;  %v807_v38 = vpop.permute.xlu0 %806 }
  0xcc   : > { %v813_v1 = vsel %vm653_vm2, %v812_v59, %v807_v38  ;;  %v814_v2 = vsel %vm655_vm3, %v807_v38, %v810_v63 }
  0xcd   : > { %v819_v3 = vmul.f32 %v817_v57, %v813_v1  ;;  %v820_v4 = vmul.f32 %v818_v58, %v814_v2  ;;  %v1671_v58 = vld [vmem:[%s2260_s25 + $0x60] sm:$0xff] }
  0xce   : > { %v932_v34 = vunpack.c.l.bf16 %v1671_v58 }
  0xcf   : > { %v821_v6 = vadd.f32 %v819_v3, %v798_v53  ;;  %v822_v7 = vadd.f32 %v820_v4, %v799_v61  ;;  %v830_v8 = vpop.permute.xlu1 %829  ;;  %v827_v9 = vpop.permute.xlu0 %826 }
  0xd0   : > { %v835_v10 = vsel %vm651_vm1, %v2123_v44, %v827_v9 }
  0xd1   : > { %v836_v41 = vsel %vm653_vm2, %v835_v10, %v830_v8 }
  0xd2   : > { %v842_v35 = vmul.f32 %v840_v5, %v836_v41 }
  0xd3   : > { %v850_v13 = vpop.permute.xlu1 %849  ;;  %v833_v14 = vpop.permute.xlu0 %832 }
  0xd4   : > { %v837_v15 = vsel %vm655_vm3, %v830_v8, %v833_v14  ;;  %v844_v16 = vadd.f32 %v842_v35, %v821_v6  ;;  %v858_v20 = vsel %vm651_vm1, %v2134_v46, %v850_v13  ;;  %v933_v6 = vunpack.c.h.bf16 %v1671_v58  ;;  %v1673_v8 = vld [vmem:[%s2260_s25 + $0x68] sm:$0xff]  ;;  %v1404_v58 = vld [vmem:[%s626_s16] sm:$0xff]  ;;  %s1886_s16 = smov 5  }
  0xd5   : > { %v843_v17 = vmul.f32 %v841_v11, %v837_v15  ;;  %v955_v12 = vunpack.c.l.bf16 %v1673_v8  ;;  %v956_v13 = vunpack.c.h.bf16 %v1673_v8  ;;  %1406 = vrot.lane.b32.xlu0 %v1404_v58, %s1879_s22  ;;  %v1837_v8 = vld [vmem:[%s2435_s8 + $0x10] sm:$0xff]  }
  0xd7   : > { %v845_v21 = vadd.f32 %v843_v17, %v822_v7  ;;  %v856_v22 = vpop.permute.xlu1 %855  ;;  %v853_v44 = vpop.permute.xlu0 %852  ;;  %v1675_v17 = vld [vmem:[%s2260_s25 + $0x70] sm:$0xff] }
  0xd8   : > { %v859_v24 = vsel %vm653_vm2, %v858_v20, %v853_v44  ;;  %v860_v36 = vsel %vm655_vm3, %v853_v44, %v856_v22  ;;  %v978_v22 = vunpack.c.l.bf16 %v1675_v17 }
  0xd9   : > { %v865_v25 = vmul.f32 %v863_v18, %v859_v24  ;;  %v866_v26 = vmul.f32 %v864_v19, %v860_v36 }
  0xdb   : > { %v867_v28 = vadd.f32 %v865_v25, %v844_v16  ;;  %v868_v29 = vadd.f32 %v866_v26, %v845_v21  ;;  %v876_v30 = vpop.permute.xlu1 %875  ;;  %v873_v31 = vpop.permute.xlu0 %872  ;;  %v979_v26 = vunpack.c.h.bf16 %v1675_v17 }
  0xdc   : > { %v881_v32 = vsel %vm651_vm1, %v2153_v49, %v873_v31 }
  0xdd   : > { %v882_v46 = vsel %vm653_vm2, %v881_v32, %v876_v30 }
  0xde   : > { %v888_v42 = vmul.f32 %v886_v27, %v882_v46 }
  0xdf   : > { %v896_v37 = vpop.permute.xlu1 %895  ;;  %v879_v43 = vpop.permute.xlu0 %878 }
  0xe0   : > { %v883_v45 = vsel %vm655_vm3, %v876_v30, %v879_v43  ;;  %v890_v47 = vadd.f32 %v888_v42, %v867_v28  ;;  %v904_v53 = vsel %vm651_vm1, %v2164_v51, %v896_v37  ;;  %v1677_v28 = vld [vmem:[%s2260_s25 + $0x78] sm:$0xff]  ;;  %s630_s25 = scalar_lea.vmem %s2430_s3, %s2356_s15 }
  0xe1   : > { %v889_v48 = vmul.f32 %v887_v39, %v883_v45  ;;  %v1001_v39 = vunpack.c.l.bf16 %v1677_v28  ;;  %v1002_v42 = vunpack.c.h.bf16 %v1677_v28 }
  0xe3   : > { %v891_v55 = vadd.f32 %v889_v48, %v868_v29  ;;  %v902_v57 = vpop.permute.xlu1 %901  ;;  %v899_v49 = vpop.permute.xlu0 %898 }
  0xe4   : > { %v905_v59 = vsel %vm653_vm2, %v904_v53, %v899_v49  ;;  %v906_v61 = vsel %vm655_vm3, %v899_v49, %v902_v57  ;;  %v1834_v49 = vld [vmem:[%s2433_s6 + $0x38] sm:$0xff]  }
  0xe5   : > { %v911_v63 = vmul.f32 %v909_v50, %v905_v59  ;;  %v912_v38 = vmul.f32 %v910_v52, %v906_v61  ;;  %v1678_v59 = vld [vmem:[%s2432_s5] ss:$0 sm:$0xff] }
  0xe7   : > { %v913_v1 = vadd.f32 %v911_v63, %v890_v47  ;;  %v914_v2 = vadd.f32 %v912_v38, %v891_v55  ;;  %v922_v3 = vpop.permute.xlu1 %921  ;;  %v919_v4 = vpop.permute.xlu0 %918 }
  0xe8   : > { %v927_v5 = vsel %vm651_vm1, %v2183_v54, %v919_v4 }
  0xe9   : > { %v928_v51 = vsel %vm653_vm2, %v927_v5, %v922_v3 }
  0xea   : > { %v934_v7 = vmul.f32 %v932_v34, %v928_v51  ;;  %v1835_v51 = vld [vmem:[%s2435_s8] sm:$0xff]  }
  0xeb   : > { %v942_v9 = vpop.permute.xlu1 %941  ;;  %v925_v10 = vpop.permute.xlu0 %924 }
  0xec   : > { %v929_v41 = vsel %vm655_vm3, %v922_v3, %v925_v10  ;;  %v936_v11 = vadd.f32 %v934_v7, %v913_v1  ;;  %v950_v14 = vsel %vm651_vm1, %v2194_v56, %v942_v9  ;;  %v1836_v7 = vld [vmem:[%s2435_s8 + $0x8] sm:$0xff]   ;;  %v1838_v9 = vld [vmem:[%s2435_s8 + $0x18] sm:$0xff]   ;;  %v1839_v10 = vld [vmem:[%s2435_s8 + $0x20] sm:$0xff]  }
  0xed   : > { %v935_v35 = vmul.f32 %v933_v6, %v929_v41  ;;  %v1840_v41 = vld [vmem:[%s2435_s8 + $0x28] sm:$0xff]  }
  0xef   : > { %v937_v15 = vadd.f32 %v935_v35, %v914_v2  ;;  %v948_v16 = vpop.permute.xlu1 %947  ;;  %v945_v54 = vpop.permute.xlu0 %944  ;;  %v1842_v35 = vld [vmem:[%s2435_s8 + $0x38] sm:$0xff]  }
  0xf0   : > { %v951_v18 = vsel %vm653_vm2, %v950_v14, %v945_v54  ;;  %v952_v19 = vsel %vm655_vm3, %v945_v54, %v948_v16  ;;  %v1883_v14 = vmov 1   ;;  %v1693_v54 = vld [vmem:[%s2434_s7] ss:$0 sm:$0xff] }
  0xf1   : > { %v957_v20 = vmul.f32 %v955_v12, %v951_v18  ;;  %v958_v21 = vmul.f32 %v956_v13, %v952_v19  ;;  %v1881_v12 = vmov 2   ;;  %v1882_v13 = vmov 3  }
  0xf2   : > { %1810 = vset.pattern.permute.xlu0 %v1881_v12  ;;  %1811 = vset.pattern.permute.xlu1 %v1882_v13 }
  0xf3   : > { %v959_v44 = vadd.f32 %v957_v20, %v936_v11  ;;  %v960_v23 = vadd.f32 %v958_v21, %v937_v15  ;;  %v968_v24 = vpop.permute.xlu1 %967  ;;  %v965_v36 = vpop.permute.xlu0 %964  ;;  %v1841_v11 = vld [vmem:[%s2435_s8 + $0x30] sm:$0xff]  }
  0xf4   : > { %v973_v25 = vsel %vm651_vm1, %v2216_v60, %v965_v36 }
  0xf5   : > { %v974_v56 = vsel %vm653_vm2, %v973_v25, %v968_v24 }
  0xf6   : > { %v980_v27 = vmul.f32 %v978_v22, %v974_v56 }
  0xf7   : > { %v988_v29 = vpop.permute.xlu1 %987  ;;  %v971_v30 = vpop.permute.xlu0 %970 }
  0xf8   : > { %v975_v31 = vsel %vm655_vm3, %v968_v24, %v971_v30  ;;  %v982_v32 = vadd.f32 %v980_v27, %v959_v44  ;;  %v996_v33 = vsel %vm651_vm1, %v2224_v62, %v988_v29  ;;  %v1833_v62 = vld [vmem:[%s2433_s6 + $0x30] sm:$0xff]  }
  0xf9   : > { %v981_v46 = vmul.f32 %v979_v26, %v975_v31  ;;  %1745 = vmatpush3.bf16.msra.mxu1 %v1833_v62 }
  0xfa   : > { %1746 = vmatprep.subr.bf16.mxu1 %v1877_v0 }
  0xfb   : > { %v994_v37 = vpop.permute.xlu1 %993  ;;  %v991_v43 = vpop.permute.xlu0 %990  ;;  %v983_v45 = vadd.f32 %v981_v46, %v960_v23  ;;  %v1390_v23 = vlaneseq }
  0xfc   : > { %v997_v60 = vsel %vm653_vm2, %v996_v33, %v991_v43  ;;  %v998_v47 = vsel %vm655_vm3, %v991_v43, %v994_v37 }
  0xfd   : > { %v1003_v48 = vmul.f32 %v1001_v39, %v997_v60  ;;  %v1004_v50 = vmul.f32 %v1002_v42, %v998_v47  ;;  %1747 = vmatpush3.bf16.msra.mxu1 %v1834_v49  ;;  %v1391_v24 = vand.u32 127, %v1390_v23 }
  0xfe   : > { %1752 = vmatprep.subr.bf16.mxu1 %v1877_v0 }
  0xff   : > { %v1006_v52 = vadd.f32 %v1004_v50, %v983_v45  ;;  %v1005_v53 = vadd.f32 %v1003_v48, %v982_v32  ;;  %vm1392_vm6 = vcmp.lt.s32.totalorder %v1391_v24, 5 }
 0x101   : > { %v1008_v55 = vpack.c.bf16 %v1006_v52, %v1006_v52  ;;  %v1007_v57 = vpack.c.bf16 %v1005_v53, %v1005_v53 }
 0x103   : > { %1692 = vmatprep.mubr.msk.bf16.mxu0 %vm1116_vm4, %v1008_v55 }
 0x104   : > { %1157 = vmatmul.mubr.bf16.vlgmr.msra.gmra.mrb[0].mxu0 %v1007_v57 }
 0x147   : > { %v1407_v63 = vpop.permute.xlu0 %1406 }
 0x148   : > { %v1409_v1 = vsub.f32 %v1404_v58, %v1407_v63 }
 0x14a   : > { %v1410_v5 = vmul.f32 0.5, %v1409_v1  ;;  %1419 = vperm.xlu0 %1810, %v1409_v1  }
 0x14c   : > { %1412 = vrot.lane.b32.xlu1 %v1410_v5, %s1880_s17  ;;  %s634_s17 = scalar_lea.vmem %s2437_s10, %s2356_s15 }
 0x14e   : > { %1812 = vset.pattern.permute.xlu0 %v1883_v14 }
 0x150   : > { %1430 = vperm.xlu1 %1811, %v1409_v1  }
 0x1be   : > { %v1413_v15 = vpop.permute.xlu1 %1412 }
 0x1bf   : > { %v1415_v16 = vadd.f32 %v1413_v15, %v1404_v58 }
 0x1c1   : > { %1435 = vperm.xlu0 %1812, %v1415_v16  }
 0x1c9   : > { %v1420_v32 = vpop.permute.xlu0 %1419 }
 0x1cf   : > { %v1431_v39 = vpop.permute.xlu1 %1430 }
 0x1d7   : > { %v1158_v61 = vpop.f32.mrb[0].mxu0 }
 0x1d8   : > { %v1159_v38 = vadd.f32 %v1678_v59, %v1158_v61  ;;  %v1160_v34 = vpop.f32.mrb[1].mxu0 }
 0x1d9   : > { %v1161_v2 = vpop.f32.mrb[2].mxu0 }
 0x1da   : > { %v1164_v3 = vmax.f32 %v1159_v38, 0.0  ;;  %v1162_v4 = vpop.f32.mrb[3].mxu0 }
 0x1dc   : > { %v1165_v6 = vpack.c.bf16 %v1164_v3, %v1164_v3 }
 0x1de   : > { %1749 = vmatmul.mubr.bf16.vlgmr.msra.gmra.mrb[0].mxu1 %v1165_v6 }
 0x1df   : > { %1753 = vmatpush3.bf16.msra.mxu1 %v1835_v51  ;;  %1768 = vmatprep.mubr.msk.bf16.mxu1 %vm1878_vm5, %v1877_v0 }
 0x1e0   : > { %1754 = vmatprep.subr.bf16.mxu1 %v1877_v0 }
 0x1e3   : > { %1755 = vmatpush3.bf16.msra.mxu1 %v1836_v7 }
 0x1e4   : > { %1756 = vmatprep.subr.bf16.mxu1 %v1877_v0 }
 0x1e7   : > { %1757 = vmatpush3.bf16.msra.mxu1 %v1837_v8 }
 0x1e8   : > { %1758 = vmatprep.subr.bf16.mxu1 %v1877_v0 }
 0x1eb   : > { %1759 = vmatpush3.bf16.msra.mxu1 %v1838_v9 }
 0x1ec   : > { %1760 = vmatprep.subr.bf16.mxu1 %v1877_v0 }
 0x1ef   : > { %1761 = vmatpush3.bf16.msra.mxu1 %v1839_v10 }
 0x1f0   : > { %1762 = vmatprep.subr.bf16.mxu1 %v1877_v0 }
 0x1f3   : > { %1763 = vmatpush3.bf16.msra.mxu1 %v1840_v41 }
 0x1f4   : > { %1764 = vmatprep.subr.bf16.mxu1 %v1877_v0 }
 0x1f7   : > { %1765 = vmatpush3.bf16.msra.mxu1 %v1841_v11 }
 0x1f8   : > { %1766 = vmatprep.subr.bf16.mxu1 %v1877_v0  ;;  %v1457_v0 = vld [vmem:[%s630_s25] sm:$0xff] }
 0x1f9   : > { %1461 = vperm.xlu0 %1812, %v1457_v0  }
 0x1fb   : > { %1767 = vmatpush3.bf16.msra.mxu1 %v1842_v35 }
 0x1fd   : > { %1813 = vset.pattern.permute.xlu0 %v1876_v40  ;;  %v1702_v40 = vld [vmem:[%s2436_s9] ss:$0 sm:$0xff] }
 0x1fe   : > { %1425 = vperm.xlu0 %1813, %v1415_v16  }
 0x202   : > { %1469 = vperm.xlu0 %1813, %v1457_v0  }
 0x240   : > { %v1436_v43 = vpop.permute.xlu0 %1435 }
 0x278   : > { %v1462_v45 = vpop.permute.xlu0 %1461 }
 0x27d   : > { %v1426_v60 = vpop.permute.xlu0 %1425 }
 0x281   : > { %v1470_v47 = vpop.permute.xlu0 %1469 }
 0x2b1   : > { %v1271_v17 = vpop.f32.mrb[0].mxu1 }
 0x2b2   : > { %v1272_v18 = vadd.f32 %v1693_v54, %v1271_v17  ;;  %v1750_v19 = vpop.f32.mrb[1].mxu1 }
 0x2b3   : > { %v1274_v20 = vpop.f32.mrb[2].mxu1 }
 0x2b4   : > { %v1277_v21 = vmax.f32 %v1272_v18, 0.0  ;;  %v1751_v22 = vpop.f32.mrb[3].mxu1 }
 0x2b6   : > { %v1278_v44 = vpack.c.bf16 %v1277_v21, %v1277_v21 }
 0x2b8   : > { %1769 = vmatmul.mubr.bf16.vlgmr.msra.gmra.mrb[4].mxu1 %v1278_v44 }
 0x38b   : > { %v1384_v36 = vpop.f32.mrb[4].mxu1 }
 0x38c   : > { %v1385_v25 = vadd.f32 %v1702_v40, %v1384_v36  ;;  %v1770_v56 = vpop.f32.mrb[5].mxu1 }
 0x38d   : > { %v1387_v26 = vpop.f32.mrb[6].mxu1 }
 0x38e   : > { %v1416_v27 = vmin.f32 %v1385_v25, 4.1351666  ;;  %v1771_v28 = vpop.f32.mrb[7].mxu1  ;;  %v1393_v29 = vsel %vm1392_vm6, %v1385_v25, -inf  ;;  %v1422_v48 = vmul.f32 %v1420_v32, %v1385_v25  ;;  %v1433_v50 = vmul.f32 %v1431_v39, %v1385_v25 }
 0x38f   : > { %1394 = vmax.xlane.f32.xlu1 %v1393_v29 }
 0x390   : > { %v1439_v30 = vmul.f32 1.442695, %v1416_v27  ;;  %v1428_v52 = vadd.f32 %v1426_v60, %v1422_v48  ;;  %v1438_v49 = vadd.f32 %v1436_v43, %v1433_v50 }
 0x392   : > { %1843 = vpow2.f32 %v1439_v30 }
 0x39c   : > { %v1844_v31 = vpop.eup %1843 }
 0x39d   : > { %v1441_v46 = vmul.f32 %v1844_v31, %v1420_v32  ;;  %v1442_v42 = vmul.f32 %v1844_v31, %v1431_v39 }
 0x39f   : > { %v1443_v33 = vmul.f32 0.5, %v1441_v46  ;;  %v1449_v37 = vmul.f32 0.5, %v1442_v42 }
 0x3a1   : > { %1445 = vrot.lane.b32.xlu0 %v1443_v33, %s1884_s29 }
 0x3a5   : > { %1451 = vrot.lane.b32.xlu0 %v1449_v37, %s1884_s29 }
 0x413   : > { %v1446_v53 = vpop.permute.xlu0 %1445 }
 0x414   : > { %v1448_v55 = vsub.f32 %v1428_v52, %v1446_v53  ;;  %v1455_v57 = vadd.f32 %v1446_v53, %v1428_v52 }
 0x416   : > { %v1458_v62 = vmax.f32 %v1448_v55, 0.0  ;;  %v1465_v59 = vmax.f32 %v1455_v57, 0.0 }
 0x417   : > { %v1452_v58 = vpop.permute.xlu0 %1451 }
 0x418   : > { %v1456_v61 = vadd.f32 %v1452_v58, %v1438_v49  ;;  %v1464_v63 = vmin.f32 %v1462_v45, %v1458_v62  ;;  %v1466_v1 = vmin.f32 %v1462_v45, %v1465_v59  ;;  %v1454_v51 = vsub.f32 %v1438_v49, %v1452_v58 }
 0x41a   : > { %1476 = vrot.lane.b32.xlu0 %v1464_v63, %s1885_s12  ;;  %v1473_v38 = vmax.f32 %v1456_v61, 0.0  ;;  %v1467_v6 = vmax.f32 %v1454_v51, 0.0 }
 0x41c   : > { %v1395_v34 = vpop.xlane.xlu1 %1394  ;;  %v1474_v4 = vmin.f32 %v1470_v47, %v1473_v38  ;;  %v1472_v7 = vmin.f32 %v1470_v47, %v1467_v6 }
 0x41d   : > { %v1396_v2 = vsub.f32 %v1393_v29, %v1395_v34 }
 0x41e   : > { %1484 = vrot.lane.b32.xlu0 %v1466_v1, %s1886_s16 }
 0x41f   : > { %v1397_v3 = vmul.f32 1.442695, %v1396_v2 }
 0x421   : > { %1845 = vpow2.f32 %v1397_v3 }
 0x422   : > { %1488 = vrot.lane.b32.xlu0 %v1474_v4, %s1886_s16 }
 0x42b   : > { %v1846_v5 = vpop.eup %1845 }
 0x42c   : > { %1399 = vadd.xlane.f32.xlu1 %v1846_v5 }
 0x43d   : > { %1480 = vrot.lane.b32.xlu1 %v1472_v7, %s1885_s12 }
 0x48c   : > { %v1477_v8 = vpop.permute.xlu0 %1476 }
 0x490   : > { %v1485_v9 = vpop.permute.xlu0 %1484 }
 0x494   : > { %v1489_v35 = vpop.permute.xlu0 %1488 }
 0x4b9   : > { %v1400_v10 = vpop.xlane.xlu1 %1399 }
 0x4ba   : > { %1847 = vrcp.f32 %v1400_v10 }
 0x4bd   : > { %v1481_v41 = vpop.permute.xlu1 %1480 }
 0x4be   : > { %v1492_v11 = vsel %vm1491_vm7, %v1477_v8, %v1481_v41 }
 0x4bf   : > { %v1494_v12 = vsel %vm1493_vm8, %v1492_v11, %v1485_v9 }
 0x4c0   : > { %v1496_v13 = vsel %vm1495_vm9, %v1494_v12, %v1489_v35 }
 0x4c1   : > { %v1498_v14 = vsel %vm1497_vm10, %v1496_v13, 0.0 }
 0x4c2   : > { %1499 = vst [vmem:[%s638_s23] sm:$0xff] %v1498_v14 }
 0x4c4   : > { %v1848_v15 = vpop.eup %1847 }
 0x4c5   : > { %v1402_v16 = vmul.f32 %v1848_v15, %v1846_v5 }
 0x4c7   : > { %1403 = vst [vmem:[%s634_s17] sm:$0xff] %v1402_v16 }
 0x4c8 PF: > { %p19_p9 = scmp.ge.s32.totalorder %s1964_s21, 4   ;;  %s2440_s17 = smov %s1867_s18 }
 0x4c9   : > { %s2441_s18 = smov %s1973_s24  ;;  %s2442_s19 = smov %s1964_s21 }
 0x4ca   :  { %21 = sbr.rel (!%p19_p9) target bundleno = 2 (0x2), region = 227 }

</bundles_post_ra>
